<compile_context>
chip_gen: v6e
topology: v6e:2x2x1
jax: 0.10.0
libtpu: 0.0.40
codegen_flags: <defaults>
</compile_context>

<pallas_src>
import functools

import jax
import jax.numpy as jnp
from jax import lax
from jax.experimental import pallas as pl
from jax.experimental.pallas import tpu as pltpu

LANE = 128


def _round_up(x, m):
    return (x + m - 1) // m * m


# -------------------- generic M-tiled matmul (+bias) kernel ------------------
def _matmul_bias_kernel(x_ref, w_ref, b_ref, o_ref, *, apply_tanh):
    y = jnp.dot(x_ref[...].astype(jnp.bfloat16),
                w_ref[...].astype(jnp.bfloat16),
                preferred_element_type=jnp.float32) + b_ref[...]
    if apply_tanh:
        y = jnp.tanh(y)
    o_ref[...] = y


def matmul_bias(x, w_t, bias, apply_tanh=False, tm_max=512):
    """(M,K) @ (K,N) + b with the M axis tiled over a "parallel" grid."""
    M, K = x.shape
    N = w_t.shape[1]
    tm = M if M <= tm_max else tm_max
    return pl.pallas_call(
        functools.partial(_matmul_bias_kernel, apply_tanh=apply_tanh),
        out_shape=jax.ShapeDtypeStruct((M, N), jnp.float32),
        grid_spec=pltpu.PrefetchScalarGridSpec(
            num_scalar_prefetch=0,
            grid=(pl.cdiv(M, tm),),
            in_specs=[
                pl.BlockSpec((tm, K), lambda i: (i, 0)),
                pl.BlockSpec((K, N), lambda i: (0, 0)),
                pl.BlockSpec((1, N), lambda i: (0, 0)),
            ],
            out_specs=pl.BlockSpec((tm, N), lambda i: (i, 0)),
        ),
        compiler_params=pltpu.CompilerParams(dimension_semantics=("parallel",)),
    )(x, w_t, bias.reshape(1, N))


def linear_lane_padded(x, w_t, bias, apply_tanh=False):
    """Linear whose output width is padded to 128 lanes inside the kernel
    (lane-dense stores) and sliced back in the wrapper."""
    N = w_t.shape[1]
    Np = _round_up(N, LANE)
    if Np != N:
        w_t = jnp.pad(w_t, ((0, 0), (0, Np - N)))
        bias = jnp.pad(bias, ((0, Np - N),))
    y = matmul_bias(x, w_t, bias, apply_tanh=apply_tanh)
    return y[:, :N]


# ---------------- LSTM recurrence (fused, time-chunk streamed) ---------------
def _lstm_kernel(x_ref, len_ref, wih_ref, whh_ref, b_ref, hout_ref, h_sc, c_sc):
    # x_ref:  (Tc, Bb, E) bf16 time-major embedding chunk (streamed per grid step)
    # len_ref:(Bb, 1) int32 valid lengths; weights bf16; bias (1, 4H) f32.
    t_idx = pl.program_id(1)
    Tc = x_ref.shape[0]
    H = hout_ref.shape[1]

    @pl.when(t_idx == 0)
    def _():
        h_sc[...] = jnp.zeros_like(h_sc)
        c_sc[...] = jnp.zeros_like(c_sc)

    wih = wih_ref[...]
    whh = whh_ref[...]
    bvec = b_ref[...]
    lens = len_ref[...]
    t_base = t_idx * Tc
    h = h_sc[...]
    c = c_sc[...]
    # Static, fully-unrolled chunk recurrence (Tc is a compile-time constant) so
    # all time-dim indexing is static and the scheduler can overlap step s+1's
    # input-projection dot with step s's elementwise tail.
    for s in range(Tc):
        gates = (jnp.dot(x_ref[s], wih, preferred_element_type=jnp.float32)
                 + bvec
                 + jnp.dot(h.astype(jnp.bfloat16), whh,
                           preferred_element_type=jnp.float32))
        # Gate layout (i | f | o | g): one sigmoid over 3H lanes + one tanh.
        # TODO(synk): per-gate split of w_hh / x-proj (lane-aligned gate buffers)
        # is a further option; verify XLU rotate count on a bundle dump first.
        sg = jax.nn.sigmoid(gates[:, :3 * H])
        g = jnp.tanh(gates[:, 3 * H:])
        i = sg[:, 0:H]
        f = sg[:, H:2 * H]
        o = sg[:, 2 * H:3 * H]
        c_new = f * c + i * g
        h_new = o * jnp.tanh(c_new)
        # DynamicLSTM / packed-sequence h_n semantics: freeze state once t >= len.
        valid = (t_base + s) < lens                        # (Bb, 1) bool
        h = jnp.where(valid, h_new, h)
        c = jnp.where(valid, c_new, c)
    h_sc[...] = h
    c_sc[...] = c
    hout_ref[...] = h


def lstm_last_hidden(x_tm, x_len, w_ih_t, w_hh_t, bias, *, time_chunk=8):
    """x_tm: (L, B, E) bf16 time-major embeddings, x_len: (B,) -> h_n (B, H) f32."""
    L, B, E = x_tm.shape
    H = w_hh_t.shape[0]
    Tc = time_chunk
    Lp = _round_up(L, Tc)
    if Lp != L:                                  # padded steps are masked by `valid`
        x_tm = jnp.pad(x_tm, ((0, Lp - L), (0, 0), (0, 0)))
    # v7x: split the batch across the two TensorCores when each half still fills
    # >= 8 sublanes; no-op (nb=1) otherwise (and irrelevant on v5e/v6e's single TC).
    nb = 2 if (B % 16 == 0) else 1
    Bb = B // nb
    len2d = x_len.reshape(B, 1).astype(jnp.int32)
    return pl.pallas_call(
        _lstm_kernel,
        out_shape=jax.ShapeDtypeStruct((B, H), jnp.float32),
        grid_spec=pltpu.PrefetchScalarGridSpec(
            num_scalar_prefetch=0,
            grid=(nb, Lp // Tc),
            in_specs=[
                pl.BlockSpec((Tc, Bb, E), lambda b, t: (t, b, 0)),
                pl.BlockSpec((Bb, 1), lambda b, t: (b, 0)),
                pl.BlockSpec((E, 4 * H), lambda b, t: (0, 0)),
                pl.BlockSpec((H, 4 * H), lambda b, t: (0, 0)),
                pl.BlockSpec((1, 4 * H), lambda b, t: (0, 0)),
            ],
            out_specs=pl.BlockSpec((Bb, H), lambda b, t: (b, 0)),
            scratch_shapes=[pltpu.VMEM((Bb, H), jnp.float32),
                            pltpu.VMEM((Bb, H), jnp.float32)],
        ),
        compiler_params=pltpu.CompilerParams(
            dimension_semantics=("parallel", "arbitrary")),
    )(x_tm, len2d, w_ih_t, w_hh_t, bias.reshape(1, 4 * H))


# ----------------- fused Conv1d(k=3) + global max-pool (ctx & asp) -----------
def _conv_pool_kernel(x_ref, w_ref, b_ref, m_ref, o_ref):
    # x_ref: (Bblk*Lm, E) bf16 - Bblk sequences of Lm rows, flattened.
    # w_ref: (E, 3*Cp) bf16   - the 3 conv taps concatenated on (padded) lanes.
    # m_ref: (Bblk*Lm, 1) i32 - 1 where the window starting at this row is valid.
    Bblk, Cp = o_ref.shape
    RL = x_ref.shape[0]
    Lm = RL // Bblk
    P = Lm - 2                                       # kernel=3, stride=1, no pad
    y = jnp.dot(x_ref[...], w_ref[...], preferred_element_type=jnp.float32)
    y = y.reshape(Bblk, Lm, 3 * Cp)
    # Shift/add the small 128-lane per-tap results instead of the E-wide input.
    acc = (y[:, 0:P, 0:Cp] + y[:, 1:P + 1, Cp:2 * Cp] + y[:, 2:P + 2, 2 * Cp:]
           + b_ref[...])                             # (Bblk, P, Cp)
    valid = m_ref[...].reshape(Bblk, Lm, 1)[:, 0:P, :] > 0
    acc = jnp.where(valid, acc, jnp.float32(-1e30))
    o_ref[...] = jnp.max(acc, axis=1)                # (Bblk, Cp) lane-dense store


def conv1d_maxpool_pair(ctx_emb, asp_emb, w_taps, bias, *, rows_per_step=8):
    """Conv1d(k=3) + global max pool for context AND aspect in one pallas_call.
    Matches the reference: pooling runs over every window of the padded batch.
    ctx_emb: (B, Lc, E) bf16, asp_emb: (B, La, E) bf16; w_taps: (3, E, Cout) bf16.
    Returns (cnn_ctx, cnn_asp), each (B, Cout) f32."""
    B, Lc, E = ctx_emb.shape
    La = asp_emb.shape[1]
    Cout = w_taps.shape[2]
    Cp = _round_up(Cout, LANE)
    # TODO(synk): Lc/La < 3 (no valid conv window) is degenerate, as in PyTorch.
    Lm = _round_up(max(Lc, La), 16)                  # keep bf16 sublane tiles aligned
    ctx_p = jnp.pad(ctx_emb, ((0, 0), (0, Lm - Lc), (0, 0)))
    asp_p = jnp.pad(asp_emb, ((0, 0), (0, Lm - La), (0, 0)))
    x = jnp.concatenate([ctx_p, asp_p], axis=0)                    # (2B, Lm, E)
    R = 2 * B
    Bblk = rows_per_step if R >= rows_per_step else R
    Rp = _round_up(R, Bblk)
    if Rp != R:
        x = jnp.pad(x, ((0, Rp - R), (0, 0), (0, 0)))
    x_flat = x.reshape(Rp * Lm, E)
    # Per-row valid-window counts: Lc-2 for context rows, La-2 for aspect rows
    # (exactly the window counts the PyTorch reference pools over); 0 for padding.
    pcounts = jnp.concatenate([
        jnp.full((B,), Lc - 2, jnp.int32),
        jnp.full((B,), La - 2, jnp.int32),
        jnp.zeros((Rp - R,), jnp.int32)])
    mask = (jnp.arange(Lm, dtype=jnp.int32)[None, :]
            < pcounts[:, None]).astype(jnp.int32).reshape(Rp * Lm, 1)
    w_pad = jnp.pad(w_taps, ((0, 0), (0, 0), (0, Cp - Cout)))      # (3, E, Cp)
    w_all = jnp.transpose(w_pad, (1, 0, 2)).reshape(E, 3 * Cp)
    b_pad = jnp.pad(bias, ((0, Cp - Cout),)).reshape(1, Cp)
    out = pl.pallas_call(
        _conv_pool_kernel,
        out_shape=jax.ShapeDtypeStruct((Rp, Cp), jnp.float32),
        grid_spec=pltpu.PrefetchScalarGridSpec(
            num_scalar_prefetch=0,
            grid=(Rp // Bblk,),
            in_specs=[
                pl.BlockSpec((Bblk * Lm, E), lambda r: (r, 0)),
                pl.BlockSpec((E, 3 * Cp), lambda r: (0, 0)),
                pl.BlockSpec((1, Cp), lambda r: (0, 0)),
                pl.BlockSpec((Bblk * Lm, 1), lambda r: (r, 0)),
            ],
            out_specs=pl.BlockSpec((Bblk, Cp), lambda r: (r, 0)),
        ),
        compiler_params=pltpu.CompilerParams(dimension_semantics=("parallel",)),
    )(x_flat, w_all, b_pad, mask)
    return out[:B, :Cout], out[B:R, :Cout]


# --------------------------- fused classifier head ----------------------------
def _head_kernel(cnn_ctx_ref, cnn_asp_ref, hn_ref, w1c_ref, w1a_ref, b1_ref,
                 w2h_ref, w2n_ref, b2_ref, o_ref):
    bf = jnp.bfloat16
    # h_h = tanh(concat(cnn_ctx, cnn_asp) @ W1 + b1), concat realised as split-W.
    h_h = jnp.tanh(
        jnp.dot(cnn_ctx_ref[...].astype(bf), w1c_ref[...],
                preferred_element_type=jnp.float32)
        + jnp.dot(cnn_asp_ref[...].astype(bf), w1a_ref[...],
                  preferred_element_type=jnp.float32)
        + b1_ref[...])
    # out = concat(h_h, h_n) @ W2 + b2  (lane-padded output width).
    o_ref[...] = (
        jnp.dot(h_h.astype(bf), w2h_ref[...], preferred_element_type=jnp.float32)
        + jnp.dot(hn_ref[...].astype(bf), w2n_ref[...],
                  preferred_element_type=jnp.float32)
        + b2_ref[...])


def classifier_head(cnn_ctx, cnn_asp, h_n, p_proj, p_total):
    B, H = h_n.shape
    P = p_total["w_t"].shape[1]
    Np = _round_up(P, LANE)
    w1 = p_proj["w_t"]                                   # (4H, H) bf16
    w1c, w1a = w1[:2 * H], w1[2 * H:]
    w2 = jnp.pad(p_total["w_t"], ((0, 0), (0, Np - P)))  # (2H, Np) bf16, lane-dense
    b2 = jnp.pad(p_total["b"], ((0, Np - P),)).reshape(1, Np)
    w2h, w2n = w2[:H], w2[H:]
    out = pl.pallas_call(
        _head_kernel,
        out_shape=jax.ShapeDtypeStruct((B, Np), jnp.float32),
    )(cnn_ctx, cnn_asp, h_n, w1c, w1a, p_proj["b"].reshape(1, H), w2h, w2n, b2)
    return out[:, :P]


# ------------------------------ parameters ------------------------------------
def init_params(key, vocab, embed_dim, hidden_dim, polarities_dim):
    ks = jax.random.split(key, 14)

    def n(k, shape, scale=0.05, dtype=jnp.float32):
        return (scale * jax.random.normal(k, shape)).astype(dtype)

    E, H, P = embed_dim, hidden_dim, polarities_dim
    bf = jnp.bfloat16
    # NOTE: cls_lstm / cls_asp_lstm / conv_gating / dense_gating of the PyTorch
    # module are never used in forward(), so they are not materialized here.
    # LSTM gate layout is (i, f, o, g) (PyTorch is (i, f, g, o)); when importing
    # real PyTorch weights, permute gate blocks and sum b_ih + b_hh.
    # Conv weight is stored per-tap: w_taps[k] = torch_weight[:, :, k].T  (E, Cout).
    return {
        "embedding": n(ks[0], (vocab, E), 0.1, dtype=bf),
        "lstm": {
            "w_ih_t": n(ks[1], (E, 4 * H), dtype=bf),
            "w_hh_t": n(ks[2], (H, 4 * H), dtype=bf),
            "bias": n(ks[3], (4 * H,)),
        },
        "dense": {"w_t": n(ks[4], (H, P), dtype=bf), "b": n(ks[5], (P,))},
        "h_h_proj": {"w_t": n(ks[6], (4 * H, H), dtype=bf), "b": n(ks[7], (H,))},
        "cls_dense": {"w_t": n(ks[8], (H, P), dtype=bf), "b": n(ks[9], (P,))},
        "dense_total": {"w_t": n(ks[10], (2 * H, P), dtype=bf), "b": n(ks[11], (P,))},
        "conv": {"w_taps": n(ks[12], (3, E, 2 * H), dtype=bf), "b": n(ks[13], (2 * H,))},
    }


# ------------------------------ forward pass ----------------------------------
def lstm_model_forward(params, text_raw_indices, aspect_indices, classifier=True):
    emb = params["embedding"]                                            # (V, E) bf16
    x_len = jnp.sum(text_raw_indices != 0, axis=-1).astype(jnp.int32)    # (B,)
    # Gather directly in time-major order: the transpose happens on the int32
    # index matrix, not on the E-wide embedding activations.
    x_tm = jnp.take(emb, text_raw_indices.T, axis=0)                     # (L, B, E) bf16

    h_n = lstm_last_hidden(x_tm, x_len, params["lstm"]["w_ih_t"],
                           params["lstm"]["w_hh_t"], params["lstm"]["bias"])

    if not classifier:
        # out = dense(h_n)  (lane-padded kernel output, sliced to polarities).
        return linear_lane_padded(h_n, params["dense"]["w_t"], params["dense"]["b"])

    ctx = jnp.take(emb, text_raw_indices, axis=0)                        # (B, L, E) bf16
    asp = jnp.take(emb, aspect_indices, axis=0)                          # (B, La, E) bf16
    cnn_ctx, cnn_asp = conv1d_maxpool_pair(ctx, asp, params["conv"]["w_taps"],
                                           params["conv"]["b"])
    # The reference forward computes class_type = cls_dense(h_h) and discards it;
    # it has no effect on the returned value, so it is skipped here.
    return classifier_head(cnn_ctx, cnn_asp, h_n,
                           params["h_h_proj"], params["dense_total"])


if __name__ == "__main__":
    VOCAB, EMBED_DIM, HIDDEN_DIM, POLARITIES = 50, 300, 32, 3
    B, L, L_ASP = 2, 16, 8

    key = jax.random.PRNGKey(0)
    k_par, k_txt, k_asp = jax.random.split(key, 3)
    params = init_params(k_par, VOCAB, EMBED_DIM, HIDDEN_DIM, POLARITIES)

    # Padded index tensors (0 = pad) with varying valid lengths.
    text = jax.random.randint(k_txt, (B, L), 1, VOCAB, dtype=jnp.int32)
    text_lens = jnp.array([L, 10], dtype=jnp.int32)
    text = jnp.where(jnp.arange(L)[None, :] < text_lens[:, None], text, 0)

    aspect = jax.random.randint(k_asp, (B, L_ASP), 1, VOCAB, dtype=jnp.int32)
    asp_lens = jnp.array([3, 2], dtype=jnp.int32)
    aspect = jnp.where(jnp.arange(L_ASP)[None, :] < asp_lens[:, None], aspect, 0)

    fwd_cls = jax.jit(functools.partial(lstm_model_forward, classifier=True))
    out = fwd_cls(params, text, aspect)
    jax.block_until_ready(out)
    assert out.shape == (B, POLARITIES), out.shape
    assert jnp.all(jnp.isfinite(out))

    fwd_plain = jax.jit(functools.partial(lstm_model_forward, classifier=False))
    out2 = fwd_plain(params, text, aspect)
    jax.block_until_ready(out2)
    assert out2.shape == (B, POLARITIES), out2.shape
    assert jnp.all(jnp.isfinite(out2))

    print("KERNEL_OK")
</pallas_src>

<mosaic_0001>
module attributes {stable_mosaic.version = 11 : i64} {
  func.func @_conv_pool_kernel(%arg0: i32, %arg1: memref<64x300xbf16, #tpu.memory_space<vmem>>, %arg2: memref<300x384xbf16, #tpu.memory_space<vmem>>, %arg3: memref<1x128xf32, #tpu.memory_space<vmem>>, %arg4: memref<64x1xi32, #tpu.memory_space<vmem>>, %arg5: memref<4x128xf32, #tpu.memory_space<vmem>>) attributes {dimension_semantics = [#tpu.dimension_semantics<parallel>], iteration_bounds = array<i64: 1>, scalar_prefetch = 0 : i64, scratch_operands = 0 : i64, tpu.core_type = #tpu.core_type<tc>, window_params = [{transform_indices = @transform_0, window_bounds = array<i64: 64, 300>}, {pipeline_mode = #tpu.pipeline_mode<synchronous>, transform_indices = @transform_1, window_bounds = array<i64: 300, 384>}, {pipeline_mode = #tpu.pipeline_mode<synchronous>, transform_indices = @transform_2, window_bounds = array<i64: 1, 128>}, {transform_indices = @transform_3, window_bounds = array<i64: 64, 1>}, {transform_indices = @transform_4, window_bounds = array<i64: 4, 128>}]} {
    %c0 = arith.constant 0 : index
    %c0_0 = arith.constant 0 : index
    %0 = vector.load %arg1[%c0, %c0_0] : memref<64x300xbf16, #tpu.memory_space<vmem>>, vector<64x300xbf16>
    %c0_1 = arith.constant 0 : index
    %c0_2 = arith.constant 0 : index
    %1 = vector.load %arg2[%c0_1, %c0_2] : memref<300x384xbf16, #tpu.memory_space<vmem>>, vector<300x384xbf16>
    %cst = arith.constant dense<0.000000e+00> : vector<64x384xf32>
    %2 = tpu.matmul %0, %1, %cst {dimension_numbers = #tpu.dot_dimension_numbers<[1], [0], [0], [1], [0, 0, 1, 1], [], []>} : vector<64x300xbf16>, vector<300x384xbf16>, vector<64x384xf32> -> vector<64x384xf32>
    %3 = vector.shape_cast %2 : vector<64x384xf32> to vector<4x16x384xf32>
    %4 = vector.extract_strided_slice %3 {offsets = [0, 0, 0], sizes = [4, 14, 128], strides = [1, 1, 1]} : vector<4x16x384xf32> to vector<4x14x128xf32>
    %5 = vector.extract_strided_slice %3 {offsets = [0, 1, 128], sizes = [4, 14, 128], strides = [1, 1, 1]} : vector<4x16x384xf32> to vector<4x14x128xf32>
    %6 = arith.addf %4, %5 : vector<4x14x128xf32>
    %7 = vector.extract_strided_slice %3 {offsets = [0, 2, 256], sizes = [4, 14, 128], strides = [1, 1, 1]} : vector<4x16x384xf32> to vector<4x14x128xf32>
    %8 = arith.addf %6, %7 : vector<4x14x128xf32>
    %c0_3 = arith.constant 0 : index
    %c0_4 = arith.constant 0 : index
    %9 = vector.load %arg3[%c0_3, %c0_4] : memref<1x128xf32, #tpu.memory_space<vmem>>, vector<1x128xf32>
    %10 = vector.shape_cast %9 : vector<1x128xf32> to vector<1x1x128xf32>
    %11 = vector.broadcast %10 : vector<1x1x128xf32> to vector<4x14x128xf32>
    %12 = arith.addf %8, %11 : vector<4x14x128xf32>
    %c0_5 = arith.constant 0 : index
    %c0_6 = arith.constant 0 : index
    %13 = vector.load %arg4[%c0_5, %c0_6] : memref<64x1xi32, #tpu.memory_space<vmem>>, vector<64x1xi32>
    %14 = vector.shape_cast %13 : vector<64x1xi32> to vector<4x16x1xi32>
    %15 = vector.extract_strided_slice %14 {offsets = [0, 0, 0], sizes = [4, 14, 1], strides = [1, 1, 1]} : vector<4x16x1xi32> to vector<4x14x1xi32>
    %c0_i32 = arith.constant 0 : i32
    %16 = vector.broadcast %c0_i32 : i32 to vector<4x14x1xi32>
    %17 = arith.cmpi sgt, %15, %16 : vector<4x14x1xi32>
    %cst_7 = arith.constant -1.000000e+30 : f32
    %18 = vector.shape_cast %17 : vector<4x14x1xi1> to vector<4x14x1xi1>
    %19 = vector.broadcast %18 : vector<4x14x1xi1> to vector<4x14x128xi1>
    %20 = vector.broadcast %cst_7 : f32 to vector<4x14x128xf32>
    %21 = arith.select %19, %12, %20 : vector<4x14x128xi1>, vector<4x14x128xf32>
    %cst_8 = arith.constant dense<0xFF800000> : vector<4x128xf32>
    %22 = vector.multi_reduction <maximumf>, %21, %cst_8 [1] : vector<4x14x128xf32> to vector<4x128xf32>
    %c0_9 = arith.constant 0 : index
    %c0_10 = arith.constant 0 : index
    %23 = vector.load %arg5[%c0_9, %c0_10] : memref<4x128xf32, #tpu.memory_space<vmem>>, vector<4x128xf32>
    tpu.vector_store %arg5[%c0_9, %c0_10], %22 {strides = array<i32>} : memref<4x128xf32, #tpu.memory_space<vmem>>, vector<4x128xf32>,
    return
  }
  func.func @transform_0(%arg0: i32) -> (i32, i32) {
    %c0_i32 = arith.constant 0 : i32
    %c0_i32_0 = arith.constant 0 : i32
    return %arg0, %c0_i32 : i32, i32
  }
  func.func @transform_1(%arg0: i32) -> (i32, i32) {
    %c0_i32 = arith.constant 0 : i32
    %c0_i32_0 = arith.constant 0 : i32
    %c0_i32_1 = arith.constant 0 : i32
    return %c0_i32, %c0_i32_0 : i32, i32
  }
  func.func @transform_2(%arg0: i32) -> (i32, i32) {
    %c0_i32 = arith.constant 0 : i32
    %c0_i32_0 = arith.constant 0 : i32
    %c0_i32_1 = arith.constant 0 : i32
    return %c0_i32, %c0_i32_0 : i32, i32
  }
  func.func @transform_3(%arg0: i32) -> (i32, i32) {
    %c0_i32 = arith.constant 0 : i32
    %c0_i32_0 = arith.constant 0 : i32
    return %arg0, %c0_i32 : i32, i32
  }
  func.func @transform_4(%arg0: i32) -> (i32, i32) {
    %c0_i32 = arith.constant 0 : i32
    %c0_i32_0 = arith.constant 0 : i32
    return %arg0, %c0_i32 : i32, i32
  }
}

module attributes {stable_mosaic.version = 11 : i64} {
  func.func @_lstm_kernel(%arg0: i32, %arg1: i32, %arg2: memref<8x2x300xbf16, #tpu.memory_space<vmem>>, %arg3: memref<2x1xi32, #tpu.memory_space<vmem>>, %arg4: memref<300x128xbf16, #tpu.memory_space<vmem>>, %arg5: memref<32x128xbf16, #tpu.memory_space<vmem>>, %arg6: memref<1x128xf32, #tpu.memory_space<vmem>>, %arg7: memref<2x32xf32, #tpu.memory_space<vmem>>, %arg8: memref<2x32xf32, #tpu.memory_space<vmem>>, %arg9: memref<2x32xf32, #tpu.memory_space<vmem>>) attributes {dimension_semantics = [#tpu.dimension_semantics<parallel>, #tpu.dimension_semantics<arbitrary>], iteration_bounds = array<i64: 1, 2>, scalar_prefetch = 0 : i64, scratch_operands = 2 : i64, tpu.core_type = #tpu.core_type<tc>, window_params = [{transform_indices = @transform_0, window_bounds = array<i64: 8, 2, 300>}, {transform_indices = @transform_1, window_bounds = array<i64: 2, 1>}, {pipeline_mode = #tpu.pipeline_mode<synchronous>, transform_indices = @transform_2, window_bounds = array<i64: 300, 128>}, {pipeline_mode = #tpu.pipeline_mode<synchronous>, transform_indices = @transform_3, window_bounds = array<i64: 32, 128>}, {pipeline_mode = #tpu.pipeline_mode<synchronous>, transform_indices = @transform_4, window_bounds = array<i64: 1, 128>}, {transform_indices = @transform_5, window_bounds = array<i64: 2, 32>}]} {
    %c0_i32 = arith.constant 0 : i32
    %0 = arith.cmpi eq, %arg1, %c0_i32 : i32
    %1 = arith.extui %0 : i1 to i32
    %c0_i32_0 = arith.constant 0 : i32
    %2 = arith.cmpi ne, %1, %c0_i32_0 : i32
    scf.if %2 {
      %cst_59 = arith.constant 0.000000e+00 : f32
      %277 = vector.broadcast %cst_59 : f32 to vector<2x32xf32>
      %c0_60 = arith.constant 0 : index
      %c0_61 = arith.constant 0 : index
      %278 = vector.load %arg8[%c0_60, %c0_61] : memref<2x32xf32, #tpu.memory_space<vmem>>, vector<2x32xf32>
      tpu.vector_store %arg8[%c0_60, %c0_61], %277 {strides = array<i32>} : memref<2x32xf32, #tpu.memory_space<vmem>>, vector<2x32xf32>,
      %cst_62 = arith.constant 0.000000e+00 : f32
      %279 = vector.broadcast %cst_62 : f32 to vector<2x32xf32>
      %c0_63 = arith.constant 0 : index
      %c0_64 = arith.constant 0 : index
      %280 = vector.load %arg9[%c0_63, %c0_64] : memref<2x32xf32, #tpu.memory_space<vmem>>, vector<2x32xf32>
      tpu.vector_store %arg9[%c0_63, %c0_64], %279 {strides = array<i32>} : memref<2x32xf32, #tpu.memory_space<vmem>>, vector<2x32xf32>,
    } else {
    }
    %c0 = arith.constant 0 : index
    %c0_1 = arith.constant 0 : index
    %3 = vector.load %arg4[%c0, %c0_1] : memref<300x128xbf16, #tpu.memory_space<vmem>>, vector<300x128xbf16>
    %c0_2 = arith.constant 0 : index
    %c0_3 = arith.constant 0 : index
    %4 = vector.load %arg5[%c0_2, %c0_3] : memref<32x128xbf16, #tpu.memory_space<vmem>>, vector<32x128xbf16>
    %c0_4 = arith.constant 0 : index
    %c0_5 = arith.constant 0 : index
    %5 = vector.load %arg6[%c0_4, %c0_5] : memref<1x128xf32, #tpu.memory_space<vmem>>, vector<1x128xf32>
    %c0_6 = arith.constant 0 : index
    %c0_7 = arith.constant 0 : index
    %6 = vector.load %arg3[%c0_6, %c0_7] : memref<2x1xi32, #tpu.memory_space<vmem>>, vector<2x1xi32>
    %c8_i32 = arith.constant 8 : i32
    %7 = arith.muli %arg1, %c8_i32 : i32
    %c0_8 = arith.constant 0 : index
    %c0_9 = arith.constant 0 : index
    %8 = vector.load %arg8[%c0_8, %c0_9] : memref<2x32xf32, #tpu.memory_space<vmem>>, vector<2x32xf32>
    %c0_10 = arith.constant 0 : index
    %c0_11 = arith.constant 0 : index
    %9 = vector.load %arg9[%c0_10, %c0_11] : memref<2x32xf32, #tpu.memory_space<vmem>>, vector<2x32xf32>
    %c0_12 = arith.constant 0 : index
    %c0_13 = arith.constant 0 : index
    %c0_14 = arith.constant 0 : index
    %10 = vector.load %arg2[%c0_12, %c0_13, %c0_14] : memref<8x2x300xbf16, #tpu.memory_space<vmem>>, vector<1x2x300xbf16>
    %11 = vector.shape_cast %10 : vector<1x2x300xbf16> to vector<2x300xbf16>
    %cst = arith.constant dense<0.000000e+00> : vector<2x128xf32>
    %12 = tpu.matmul %11, %3, %cst {dimension_numbers = #tpu.dot_dimension_numbers<[1], [0], [0], [1], [0, 0, 1, 1], [], []>} : vector<2x300xbf16>, vector<300x128xbf16>, vector<2x128xf32> -> vector<2x128xf32>
    %13 = vector.broadcast %5 : vector<1x128xf32> to vector<2x128xf32>
    %14 = arith.addf %12, %13 : vector<2x128xf32>
    %15 = arith.truncf %8 : vector<2x32xf32> to vector<2x32xbf16>
    %cst_15 = arith.constant dense<0.000000e+00> : vector<2x128xf32>
    %16 = tpu.matmul %15, %4, %cst_15 {dimension_numbers = #tpu.dot_dimension_numbers<[1], [0], [0], [1], [0, 0, 1, 1], [], []>} : vector<2x32xbf16>, vector<32x128xbf16>, vector<2x128xf32> -> vector<2x128xf32>
    %17 = arith.addf %14, %16 : vector<2x128xf32>
    %18 = vector.extract_strided_slice %17 {offsets = [0, 0], sizes = [2, 96], strides = [1, 1]} : vector<2x128xf32> to vector<2x96xf32>
    %19 = arith.negf %18 : vector<2x96xf32>
    %20 = math.exp %19 : vector<2x96xf32>
    %cst_16 = arith.constant 1.000000e+00 : f32
    %21 = vector.broadcast %cst_16 : f32 to vector<2x96xf32>
    %22 = arith.addf %21, %20 : vector<2x96xf32>
    %23 = arith.divf %21, %22 : vector<2x96xf32>
    %24 = vector.extract_strided_slice %17 {offsets = [0, 96], sizes = [2, 32], strides = [1, 1]} : vector<2x128xf32> to vector<2x32xf32>
    %25 = math.tanh %24 : vector<2x32xf32>
    %26 = vector.extract_strided_slice %23 {offsets = [0, 0], sizes = [2, 32], strides = [1, 1]} : vector<2x96xf32> to vector<2x32xf32>
    %27 = vector.extract_strided_slice %23 {offsets = [0, 32], sizes = [2, 32], strides = [1, 1]} : vector<2x96xf32> to vector<2x32xf32>
    %28 = vector.extract_strided_slice %23 {offsets = [0, 64], sizes = [2, 32], strides = [1, 1]} : vector<2x96xf32> to vector<2x32xf32>
    %29 = arith.mulf %27, %9 : vector<2x32xf32>
    %30 = arith.mulf %26, %25 : vector<2x32xf32>
    %31 = arith.addf %29, %30 : vector<2x32xf32>
    %32 = math.tanh %31 : vector<2x32xf32>
    %33 = arith.mulf %28, %32 : vector<2x32xf32>
    %c0_i32_17 = arith.constant 0 : i32
    %34 = arith.addi %7, %c0_i32_17 : i32
    %35 = vector.broadcast %34 : i32 to vector<2x1xi32>
    %36 = arith.cmpi slt, %35, %6 : vector<2x1xi32>
    %37 = vector.shape_cast %36 : vector<2x1xi1> to vector<2x1xi1>
    %38 = vector.broadcast %37 : vector<2x1xi1> to vector<2x32xi1>
    %39 = arith.select %38, %33, %8 : vector<2x32xi1>, vector<2x32xf32>
    %40 = vector.shape_cast %36 : vector<2x1xi1> to vector<2x1xi1>
    %41 = vector.broadcast %40 : vector<2x1xi1> to vector<2x32xi1>
    %42 = arith.select %41, %31, %9 : vector<2x32xi1>, vector<2x32xf32>
    %c1 = arith.constant 1 : index
    %c0_18 = arith.constant 0 : index
    %c0_19 = arith.constant 0 : index
    %43 = vector.load %arg2[%c1, %c0_18, %c0_19] : memref<8x2x300xbf16, #tpu.memory_space<vmem>>, vector<1x2x300xbf16>
    %44 = vector.shape_cast %43 : vector<1x2x300xbf16> to vector<2x300xbf16>
    %cst_20 = arith.constant dense<0.000000e+00> : vector<2x128xf32>
    %45 = tpu.matmul %44, %3, %cst_20 {dimension_numbers = #tpu.dot_dimension_numbers<[1], [0], [0], [1], [0, 0, 1, 1], [], []>} : vector<2x300xbf16>, vector<300x128xbf16>, vector<2x128xf32> -> vector<2x128xf32>
    %46 = vector.broadcast %5 : vector<1x128xf32> to vector<2x128xf32>
    %47 = arith.addf %45, %46 : vector<2x128xf32>
    %48 = arith.truncf %39 : vector<2x32xf32> to vector<2x32xbf16>
    %cst_21 = arith.constant dense<0.000000e+00> : vector<2x128xf32>
    %49 = tpu.matmul %48, %4, %cst_21 {dimension_numbers = #tpu.dot_dimension_numbers<[1], [0], [0], [1], [0, 0, 1, 1], [], []>} : vector<2x32xbf16>, vector<32x128xbf16>, vector<2x128xf32> -> vector<2x128xf32>
    %50 = arith.addf %47, %49 : vector<2x128xf32>
    %51 = vector.extract_strided_slice %50 {offsets = [0, 0], sizes = [2, 96], strides = [1, 1]} : vector<2x128xf32> to vector<2x96xf32>
    %52 = arith.negf %51 : vector<2x96xf32>
    %53 = math.exp %52 : vector<2x96xf32>
    %cst_22 = arith.constant 1.000000e+00 : f32
    %54 = vector.broadcast %cst_22 : f32 to vector<2x96xf32>
    %55 = arith.addf %54, %53 : vector<2x96xf32>
    %56 = arith.divf %54, %55 : vector<2x96xf32>
    %57 = vector.extract_strided_slice %50 {offsets = [0, 96], sizes = [2, 32], strides = [1, 1]} : vector<2x128xf32> to vector<2x32xf32>
    %58 = math.tanh %57 : vector<2x32xf32>
    %59 = vector.extract_strided_slice %56 {offsets = [0, 0], sizes = [2, 32], strides = [1, 1]} : vector<2x96xf32> to vector<2x32xf32>
    %60 = vector.extract_strided_slice %56 {offsets = [0, 32], sizes = [2, 32], strides = [1, 1]} : vector<2x96xf32> to vector<2x32xf32>
    %61 = vector.extract_strided_slice %56 {offsets = [0, 64], sizes = [2, 32], strides = [1, 1]} : vector<2x96xf32> to vector<2x32xf32>
    %62 = arith.mulf %60, %42 : vector<2x32xf32>
    %63 = arith.mulf %59, %58 : vector<2x32xf32>
    %64 = arith.addf %62, %63 : vector<2x32xf32>
    %65 = math.tanh %64 : vector<2x32xf32>
    %66 = arith.mulf %61, %65 : vector<2x32xf32>
    %c1_i32 = arith.constant 1 : i32
    %67 = arith.addi %7, %c1_i32 : i32
    %68 = vector.broadcast %67 : i32 to vector<2x1xi32>
    %69 = arith.cmpi slt, %68, %6 : vector<2x1xi32>
    %70 = vector.shape_cast %69 : vector<2x1xi1> to vector<2x1xi1>
    %71 = vector.broadcast %70 : vector<2x1xi1> to vector<2x32xi1>
    %72 = arith.select %71, %66, %39 : vector<2x32xi1>, vector<2x32xf32>
    %73 = vector.shape_cast %69 : vector<2x1xi1> to vector<2x1xi1>
    %74 = vector.broadcast %73 : vector<2x1xi1> to vector<2x32xi1>
    %75 = arith.select %74, %64, %42 : vector<2x32xi1>, vector<2x32xf32>
    %c2 = arith.constant 2 : index
    %c0_23 = arith.constant 0 : index
    %c0_24 = arith.constant 0 : index
    %76 = vector.load %arg2[%c2, %c0_23, %c0_24] : memref<8x2x300xbf16, #tpu.memory_space<vmem>>, vector<1x2x300xbf16>
    %77 = vector.shape_cast %76 : vector<1x2x300xbf16> to vector<2x300xbf16>
    %cst_25 = arith.constant dense<0.000000e+00> : vector<2x128xf32>
    %78 = tpu.matmul %77, %3, %cst_25 {dimension_numbers = #tpu.dot_dimension_numbers<[1], [0], [0], [1], [0, 0, 1, 1], [], []>} : vector<2x300xbf16>, vector<300x128xbf16>, vector<2x128xf32> -> vector<2x128xf32>
    %79 = vector.broadcast %5 : vector<1x128xf32> to vector<2x128xf32>
    %80 = arith.addf %78, %79 : vector<2x128xf32>
    %81 = arith.truncf %72 : vector<2x32xf32> to vector<2x32xbf16>
    %cst_26 = arith.constant dense<0.000000e+00> : vector<2x128xf32>
    %82 = tpu.matmul %81, %4, %cst_26 {dimension_numbers = #tpu.dot_dimension_numbers<[1], [0], [0], [1], [0, 0, 1, 1], [], []>} : vector<2x32xbf16>, vector<32x128xbf16>, vector<2x128xf32> -> vector<2x128xf32>
    %83 = arith.addf %80, %82 : vector<2x128xf32>
    %84 = vector.extract_strided_slice %83 {offsets = [0, 0], sizes = [2, 96], strides = [1, 1]} : vector<2x128xf32> to vector<2x96xf32>
    %85 = arith.negf %84 : vector<2x96xf32>
    %86 = math.exp %85 : vector<2x96xf32>
    %cst_27 = arith.constant 1.000000e+00 : f32
    %87 = vector.broadcast %cst_27 : f32 to vector<2x96xf32>
    %88 = arith.addf %87, %86 : vector<2x96xf32>
    %89 = arith.divf %87, %88 : vector<2x96xf32>
    %90 = vector.extract_strided_slice %83 {offsets = [0, 96], sizes = [2, 32], strides = [1, 1]} : vector<2x128xf32> to vector<2x32xf32>
    %91 = math.tanh %90 : vector<2x32xf32>
    %92 = vector.extract_strided_slice %89 {offsets = [0, 0], sizes = [2, 32], strides = [1, 1]} : vector<2x96xf32> to vector<2x32xf32>
    %93 = vector.extract_strided_slice %89 {offsets = [0, 32], sizes = [2, 32], strides = [1, 1]} : vector<2x96xf32> to vector<2x32xf32>
    %94 = vector.extract_strided_slice %89 {offsets = [0, 64], sizes = [2, 32], strides = [1, 1]} : vector<2x96xf32> to vector<2x32xf32>
    %95 = arith.mulf %93, %75 : vector<2x32xf32>
    %96 = arith.mulf %92, %91 : vector<2x32xf32>
    %97 = arith.addf %95, %96 : vector<2x32xf32>
    %98 = math.tanh %97 : vector<2x32xf32>
    %99 = arith.mulf %94, %98 : vector<2x32xf32>
    %c2_i32 = arith.constant 2 : i32
    %100 = arith.addi %7, %c2_i32 : i32
    %101 = vector.broadcast %100 : i32 to vector<2x1xi32>
    %102 = arith.cmpi slt, %101, %6 : vector<2x1xi32>
    %103 = vector.shape_cast %102 : vector<2x1xi1> to vector<2x1xi1>
    %104 = vector.broadcast %103 : vector<2x1xi1> to vector<2x32xi1>
    %105 = arith.select %104, %99, %72 : vector<2x32xi1>, vector<2x32xf32>
    %106 = vector.shape_cast %102 : vector<2x1xi1> to vector<2x1xi1>
    %107 = vector.broadcast %106 : vector<2x1xi1> to vector<2x32xi1>
    %108 = arith.select %107, %97, %75 : vector<2x32xi1>, vector<2x32xf32>
    %c3 = arith.constant 3 : index
    %c0_28 = arith.constant 0 : index
    %c0_29 = arith.constant 0 : index
    %109 = vector.load %arg2[%c3, %c0_28, %c0_29] : memref<8x2x300xbf16, #tpu.memory_space<vmem>>, vector<1x2x300xbf16>
    %110 = vector.shape_cast %109 : vector<1x2x300xbf16> to vector<2x300xbf16>
    %cst_30 = arith.constant dense<0.000000e+00> : vector<2x128xf32>
    %111 = tpu.matmul %110, %3, %cst_30 {dimension_numbers = #tpu.dot_dimension_numbers<[1], [0], [0], [1], [0, 0, 1, 1], [], []>} : vector<2x300xbf16>, vector<300x128xbf16>, vector<2x128xf32> -> vector<2x128xf32>
    %112 = vector.broadcast %5 : vector<1x128xf32> to vector<2x128xf32>
    %113 = arith.addf %111, %112 : vector<2x128xf32>
    %114 = arith.truncf %105 : vector<2x32xf32> to vector<2x32xbf16>
    %cst_31 = arith.constant dense<0.000000e+00> : vector<2x128xf32>
    %115 = tpu.matmul %114, %4, %cst_31 {dimension_numbers = #tpu.dot_dimension_numbers<[1], [0], [0], [1], [0, 0, 1, 1], [], []>} : vector<2x32xbf16>, vector<32x128xbf16>, vector<2x128xf32> -> vector<2x128xf32>
    %116 = arith.addf %113, %115 : vector<2x128xf32>
    %117 = vector.extract_strided_slice %116 {offsets = [0, 0], sizes = [2, 96], strides = [1, 1]} : vector<2x128xf32> to vector<2x96xf32>
    %118 = arith.negf %117 : vector<2x96xf32>
    %119 = math.exp %118 : vector<2x96xf32>
    %cst_32 = arith.constant 1.000000e+00 : f32
    %120 = vector.broadcast %cst_32 : f32 to vector<2x96xf32>
    %121 = arith.addf %120, %119 : vector<2x96xf32>
    %122 = arith.divf %120, %121 : vector<2x96xf32>
    %123 = vector.extract_strided_slice %116 {offsets = [0, 96], sizes = [2, 32], strides = [1, 1]} : vector<2x128xf32> to vector<2x32xf32>
    %124 = math.tanh %123 : vector<2x32xf32>
    %125 = vector.extract_strided_slice %122 {offsets = [0, 0], sizes = [2, 32], strides = [1, 1]} : vector<2x96xf32> to vector<2x32xf32>
    %126 = vector.extract_strided_slice %122 {offsets = [0, 32], sizes = [2, 32], strides = [1, 1]} : vector<2x96xf32> to vector<2x32xf32>
    %127 = vector.extract_strided_slice %122 {offsets = [0, 64], sizes = [2, 32], strides = [1, 1]} : vector<2x96xf32> to vector<2x32xf32>
    %128 = arith.mulf %126, %108 : vector<2x32xf32>
    %129 = arith.mulf %125, %124 : vector<2x32xf32>
    %130 = arith.addf %128, %129 : vector<2x32xf32>
    %131 = math.tanh %130 : vector<2x32xf32>
    %132 = arith.mulf %127, %131 : vector<2x32xf32>
    %c3_i32 = arith.constant 3 : i32
    %133 = arith.addi %7, %c3_i32 : i32
    %134 = vector.broadcast %133 : i32 to vector<2x1xi32>
    %135 = arith.cmpi slt, %134, %6 : vector<2x1xi32>
    %136 = vector.shape_cast %135 : vector<2x1xi1> to vector<2x1xi1>
    %137 = vector.broadcast %136 : vector<2x1xi1> to vector<2x32xi1>
    %138 = arith.select %137, %132, %105 : vector<2x32xi1>, vector<2x32xf32>
    %139 = vector.shape_cast %135 : vector<2x1xi1> to vector<2x1xi1>
    %140 = vector.broadcast %139 : vector<2x1xi1> to vector<2x32xi1>
    %141 = arith.select %140, %130, %108 : vector<2x32xi1>, vector<2x32xf32>
    %c4 = arith.constant 4 : index
    %c0_33 = arith.constant 0 : index
    %c0_34 = arith.constant 0 : index
    %142 = vector.load %arg2[%c4, %c0_33, %c0_34] : memref<8x2x300xbf16, #tpu.memory_space<vmem>>, vector<1x2x300xbf16>
    %143 = vector.shape_cast %142 : vector<1x2x300xbf16> to vector<2x300xbf16>
    %cst_35 = arith.constant dense<0.000000e+00> : vector<2x128xf32>
    %144 = tpu.matmul %143, %3, %cst_35 {dimension_numbers = #tpu.dot_dimension_numbers<[1], [0], [0], [1], [0, 0, 1, 1], [], []>} : vector<2x300xbf16>, vector<300x128xbf16>, vector<2x128xf32> -> vector<2x128xf32>
    %145 = vector.broadcast %5 : vector<1x128xf32> to vector<2x128xf32>
    %146 = arith.addf %144, %145 : vector<2x128xf32>
    %147 = arith.truncf %138 : vector<2x32xf32> to vector<2x32xbf16>
    %cst_36 = arith.constant dense<0.000000e+00> : vector<2x128xf32>
    %148 = tpu.matmul %147, %4, %cst_36 {dimension_numbers = #tpu.dot_dimension_numbers<[1], [0], [0], [1], [0, 0, 1, 1], [], []>} : vector<2x32xbf16>, vector<32x128xbf16>, vector<2x128xf32> -> vector<2x128xf32>
    %149 = arith.addf %146, %148 : vector<2x128xf32>
    %150 = vector.extract_strided_slice %149 {offsets = [0, 0], sizes = [2, 96], strides = [1, 1]} : vector<2x128xf32> to vector<2x96xf32>
    %151 = arith.negf %150 : vector<2x96xf32>
    %152 = math.exp %151 : vector<2x96xf32>
    %cst_37 = arith.constant 1.000000e+00 : f32
    %153 = vector.broadcast %cst_37 : f32 to vector<2x96xf32>
    %154 = arith.addf %153, %152 : vector<2x96xf32>
    %155 = arith.divf %153, %154 : vector<2x96xf32>
    %156 = vector.extract_strided_slice %149 {offsets = [0, 96], sizes = [2, 32], strides = [1, 1]} : vector<2x128xf32> to vector<2x32xf32>
    %157 = math.tanh %156 : vector<2x32xf32>
    %158 = vector.extract_strided_slice %155 {offsets = [0, 0], sizes = [2, 32], strides = [1, 1]} : vector<2x96xf32> to vector<2x32xf32>
    %159 = vector.extract_strided_slice %155 {offsets = [0, 32], sizes = [2, 32], strides = [1, 1]} : vector<2x96xf32> to vector<2x32xf32>
    %160 = vector.extract_strided_slice %155 {offsets = [0, 64], sizes = [2, 32], strides = [1, 1]} : vector<2x96xf32> to vector<2x32xf32>
    %161 = arith.mulf %159, %141 : vector<2x32xf32>
    %162 = arith.mulf %158, %157 : vector<2x32xf32>
    %163 = arith.addf %161, %162 : vector<2x32xf32>
    %164 = math.tanh %163 : vector<2x32xf32>
    %165 = arith.mulf %160, %164 : vector<2x32xf32>
    %c4_i32 = arith.constant 4 : i32
    %166 = arith.addi %7, %c4_i32 : i32
    %167 = vector.broadcast %166 : i32 to vector<2x1xi32>
    %168 = arith.cmpi slt, %167, %6 : vector<2x1xi32>
    %169 = vector.shape_cast %168 : vector<2x1xi1> to vector<2x1xi1>
    %170 = vector.broadcast %169 : vector<2x1xi1> to vector<2x32xi1>
    %171 = arith.select %170, %165, %138 : vector<2x32xi1>, vector<2x32xf32>
    %172 = vector.shape_cast %168 : vector<2x1xi1> to vector<2x1xi1>
    %173 = vector.broadcast %172 : vector<2x1xi1> to vector<2x32xi1>
    %174 = arith.select %173, %163, %141 : vector<2x32xi1>, vector<2x32xf32>
    %c5 = arith.constant 5 : index
    %c0_38 = arith.constant 0 : index
    %c0_39 = arith.constant 0 : index
    %175 = vector.load %arg2[%c5, %c0_38, %c0_39] : memref<8x2x300xbf16, #tpu.memory_space<vmem>>, vector<1x2x300xbf16>
    %176 = vector.shape_cast %175 : vector<1x2x300xbf16> to vector<2x300xbf16>
    %cst_40 = arith.constant dense<0.000000e+00> : vector<2x128xf32>
    %177 = tpu.matmul %176, %3, %cst_40 {dimension_numbers = #tpu.dot_dimension_numbers<[1], [0], [0], [1], [0, 0, 1, 1], [], []>} : vector<2x300xbf16>, vector<300x128xbf16>, vector<2x128xf32> -> vector<2x128xf32>
    %178 = vector.broadcast %5 : vector<1x128xf32> to vector<2x128xf32>
    %179 = arith.addf %177, %178 : vector<2x128xf32>
    %180 = arith.truncf %171 : vector<2x32xf32> to vector<2x32xbf16>
    %cst_41 = arith.constant dense<0.000000e+00> : vector<2x128xf32>
    %181 = tpu.matmul %180, %4, %cst_41 {dimension_numbers = #tpu.dot_dimension_numbers<[1], [0], [0], [1], [0, 0, 1, 1], [], []>} : vector<2x32xbf16>, vector<32x128xbf16>, vector<2x128xf32> -> vector<2x128xf32>
    %182 = arith.addf %179, %181 : vector<2x128xf32>
    %183 = vector.extract_strided_slice %182 {offsets = [0, 0], sizes = [2, 96], strides = [1, 1]} : vector<2x128xf32> to vector<2x96xf32>
    %184 = arith.negf %183 : vector<2x96xf32>
    %185 = math.exp %184 : vector<2x96xf32>
    %cst_42 = arith.constant 1.000000e+00 : f32
    %186 = vector.broadcast %cst_42 : f32 to vector<2x96xf32>
    %187 = arith.addf %186, %185 : vector<2x96xf32>
    %188 = arith.divf %186, %187 : vector<2x96xf32>
    %189 = vector.extract_strided_slice %182 {offsets = [0, 96], sizes = [2, 32], strides = [1, 1]} : vector<2x128xf32> to vector<2x32xf32>
    %190 = math.tanh %189 : vector<2x32xf32>
    %191 = vector.extract_strided_slice %188 {offsets = [0, 0], sizes = [2, 32], strides = [1, 1]} : vector<2x96xf32> to vector<2x32xf32>
    %192 = vector.extract_strided_slice %188 {offsets = [0, 32], sizes = [2, 32], strides = [1, 1]} : vector<2x96xf32> to vector<2x32xf32>
    %193 = vector.extract_strided_slice %188 {offsets = [0, 64], sizes = [2, 32], strides = [1, 1]} : vector<2x96xf32> to vector<2x32xf32>
    %194 = arith.mulf %192, %174 : vector<2x32xf32>
    %195 = arith.mulf %191, %190 : vector<2x32xf32>
    %196 = arith.addf %194, %195 : vector<2x32xf32>
    %197 = math.tanh %196 : vector<2x32xf32>
    %198 = arith.mulf %193, %197 : vector<2x32xf32>
    %c5_i32 = arith.constant 5 : i32
    %199 = arith.addi %7, %c5_i32 : i32
    %200 = vector.broadcast %199 : i32 to vector<2x1xi32>
    %201 = arith.cmpi slt, %200, %6 : vector<2x1xi32>
    %202 = vector.shape_cast %201 : vector<2x1xi1> to vector<2x1xi1>
    %203 = vector.broadcast %202 : vector<2x1xi1> to vector<2x32xi1>
    %204 = arith.select %203, %198, %171 : vector<2x32xi1>, vector<2x32xf32>
    %205 = vector.shape_cast %201 : vector<2x1xi1> to vector<2x1xi1>
    %206 = vector.broadcast %205 : vector<2x1xi1> to vector<2x32xi1>
    %207 = arith.select %206, %196, %174 : vector<2x32xi1>, vector<2x32xf32>
    %c6 = arith.constant 6 : index
    %c0_43 = arith.constant 0 : index
    %c0_44 = arith.constant 0 : index
    %208 = vector.load %arg2[%c6, %c0_43, %c0_44] : memref<8x2x300xbf16, #tpu.memory_space<vmem>>, vector<1x2x300xbf16>
    %209 = vector.shape_cast %208 : vector<1x2x300xbf16> to vector<2x300xbf16>
    %cst_45 = arith.constant dense<0.000000e+00> : vector<2x128xf32>
    %210 = tpu.matmul %209, %3, %cst_45 {dimension_numbers = #tpu.dot_dimension_numbers<[1], [0], [0], [1], [0, 0, 1, 1], [], []>} : vector<2x300xbf16>, vector<300x128xbf16>, vector<2x128xf32> -> vector<2x128xf32>
    %211 = vector.broadcast %5 : vector<1x128xf32> to vector<2x128xf32>
    %212 = arith.addf %210, %211 : vector<2x128xf32>
    %213 = arith.truncf %204 : vector<2x32xf32> to vector<2x32xbf16>
    %cst_46 = arith.constant dense<0.000000e+00> : vector<2x128xf32>
    %214 = tpu.matmul %213, %4, %cst_46 {dimension_numbers = #tpu.dot_dimension_numbers<[1], [0], [0], [1], [0, 0, 1, 1], [], []>} : vector<2x32xbf16>, vector<32x128xbf16>, vector<2x128xf32> -> vector<2x128xf32>
    %215 = arith.addf %212, %214 : vector<2x128xf32>
    %216 = vector.extract_strided_slice %215 {offsets = [0, 0], sizes = [2, 96], strides = [1, 1]} : vector<2x128xf32> to vector<2x96xf32>
    %217 = arith.negf %216 : vector<2x96xf32>
    %218 = math.exp %217 : vector<2x96xf32>
    %cst_47 = arith.constant 1.000000e+00 : f32
    %219 = vector.broadcast %cst_47 : f32 to vector<2x96xf32>
    %220 = arith.addf %219, %218 : vector<2x96xf32>
    %221 = arith.divf %219, %220 : vector<2x96xf32>
    %222 = vector.extract_strided_slice %215 {offsets = [0, 96], sizes = [2, 32], strides = [1, 1]} : vector<2x128xf32> to vector<2x32xf32>
    %223 = math.tanh %222 : vector<2x32xf32>
    %224 = vector.extract_strided_slice %221 {offsets = [0, 0], sizes = [2, 32], strides = [1, 1]} : vector<2x96xf32> to vector<2x32xf32>
    %225 = vector.extract_strided_slice %221 {offsets = [0, 32], sizes = [2, 32], strides = [1, 1]} : vector<2x96xf32> to vector<2x32xf32>
    %226 = vector.extract_strided_slice %221 {offsets = [0, 64], sizes = [2, 32], strides = [1, 1]} : vector<2x96xf32> to vector<2x32xf32>
    %227 = arith.mulf %225, %207 : vector<2x32xf32>
    %228 = arith.mulf %224, %223 : vector<2x32xf32>
    %229 = arith.addf %227, %228 : vector<2x32xf32>
    %230 = math.tanh %229 : vector<2x32xf32>
    %231 = arith.mulf %226, %230 : vector<2x32xf32>
    %c6_i32 = arith.constant 6 : i32
    %232 = arith.addi %7, %c6_i32 : i32
    %233 = vector.broadcast %232 : i32 to vector<2x1xi32>
    %234 = arith.cmpi slt, %233, %6 : vector<2x1xi32>
    %235 = vector.shape_cast %234 : vector<2x1xi1> to vector<2x1xi1>
    %236 = vector.broadcast %235 : vector<2x1xi1> to vector<2x32xi1>
    %237 = arith.select %236, %231, %204 : vector<2x32xi1>, vector<2x32xf32>
    %238 = vector.shape_cast %234 : vector<2x1xi1> to vector<2x1xi1>
    %239 = vector.broadcast %238 : vector<2x1xi1> to vector<2x32xi1>
    %240 = arith.select %239, %229, %207 : vector<2x32xi1>, vector<2x32xf32>
    %c7 = arith.constant 7 : index
    %c0_48 = arith.constant 0 : index
    %c0_49 = arith.constant 0 : index
    %241 = vector.load %arg2[%c7, %c0_48, %c0_49] : memref<8x2x300xbf16, #tpu.memory_space<vmem>>, vector<1x2x300xbf16>
    %242 = vector.shape_cast %241 : vector<1x2x300xbf16> to vector<2x300xbf16>
    %cst_50 = arith.constant dense<0.000000e+00> : vector<2x128xf32>
    %243 = tpu.matmul %242, %3, %cst_50 {dimension_numbers = #tpu.dot_dimension_numbers<[1], [0], [0], [1], [0, 0, 1, 1], [], []>} : vector<2x300xbf16>, vector<300x128xbf16>, vector<2x128xf32> -> vector<2x128xf32>
    %244 = vector.broadcast %5 : vector<1x128xf32> to vector<2x128xf32>
    %245 = arith.addf %243, %244 : vector<2x128xf32>
    %246 = arith.truncf %237 : vector<2x32xf32> to vector<2x32xbf16>
    %cst_51 = arith.constant dense<0.000000e+00> : vector<2x128xf32>
    %247 = tpu.matmul %246, %4, %cst_51 {dimension_numbers = #tpu.dot_dimension_numbers<[1], [0], [0], [1], [0, 0, 1, 1], [], []>} : vector<2x32xbf16>, vector<32x128xbf16>, vector<2x128xf32> -> vector<2x128xf32>
    %248 = arith.addf %245, %247 : vector<2x128xf32>
    %249 = vector.extract_strided_slice %248 {offsets = [0, 0], sizes = [2, 96], strides = [1, 1]} : vector<2x128xf32> to vector<2x96xf32>
    %250 = arith.negf %249 : vector<2x96xf32>
    %251 = math.exp %250 : vector<2x96xf32>
    %cst_52 = arith.constant 1.000000e+00 : f32
    %252 = vector.broadcast %cst_52 : f32 to vector<2x96xf32>
    %253 = arith.addf %252, %251 : vector<2x96xf32>
    %254 = arith.divf %252, %253 : vector<2x96xf32>
    %255 = vector.extract_strided_slice %248 {offsets = [0, 96], sizes = [2, 32], strides = [1, 1]} : vector<2x128xf32> to vector<2x32xf32>
    %256 = math.tanh %255 : vector<2x32xf32>
    %257 = vector.extract_strided_slice %254 {offsets = [0, 0], sizes = [2, 32], strides = [1, 1]} : vector<2x96xf32> to vector<2x32xf32>
    %258 = vector.extract_strided_slice %254 {offsets = [0, 32], sizes = [2, 32], strides = [1, 1]} : vector<2x96xf32> to vector<2x32xf32>
    %259 = vector.extract_strided_slice %254 {offsets = [0, 64], sizes = [2, 32], strides = [1, 1]} : vector<2x96xf32> to vector<2x32xf32>
    %260 = arith.mulf %258, %240 : vector<2x32xf32>
    %261 = arith.mulf %257, %256 : vector<2x32xf32>
    %262 = arith.addf %260, %261 : vector<2x32xf32>
    %263 = math.tanh %262 : vector<2x32xf32>
    %264 = arith.mulf %259, %263 : vector<2x32xf32>
    %c7_i32 = arith.constant 7 : i32
    %265 = arith.addi %7, %c7_i32 : i32
    %266 = vector.broadcast %265 : i32 to vector<2x1xi32>
    %267 = arith.cmpi slt, %266, %6 : vector<2x1xi32>
    %268 = vector.shape_cast %267 : vector<2x1xi1> to vector<2x1xi1>
    %269 = vector.broadcast %268 : vector<2x1xi1> to vector<2x32xi1>
    %270 = arith.select %269, %264, %237 : vector<2x32xi1>, vector<2x32xf32>
    %271 = vector.shape_cast %267 : vector<2x1xi1> to vector<2x1xi1>
    %272 = vector.broadcast %271 : vector<2x1xi1> to vector<2x32xi1>
    %273 = arith.select %272, %262, %240 : vector<2x32xi1>, vector<2x32xf32>
    %c0_53 = arith.constant 0 : index
    %c0_54 = arith.constant 0 : index
    %274 = vector.load %arg8[%c0_53, %c0_54] : memref<2x32xf32, #tpu.memory_space<vmem>>, vector<2x32xf32>
    tpu.vector_store %arg8[%c0_53, %c0_54], %270 {strides = array<i32>} : memref<2x32xf32, #tpu.memory_space<vmem>>, vector<2x32xf32>,
    %c0_55 = arith.constant 0 : index
    %c0_56 = arith.constant 0 : index
    %275 = vector.load %arg9[%c0_55, %c0_56] : memref<2x32xf32, #tpu.memory_space<vmem>>, vector<2x32xf32>
    tpu.vector_store %arg9[%c0_55, %c0_56], %273 {strides = array<i32>} : memref<2x32xf32, #tpu.memory_space<vmem>>, vector<2x32xf32>,
    %c0_57 = arith.constant 0 : index
    %c0_58 = arith.constant 0 : index
    %276 = vector.load %arg7[%c0_57, %c0_58] : memref<2x32xf32, #tpu.memory_space<vmem>>, vector<2x32xf32>
    tpu.vector_store %arg7[%c0_57, %c0_58], %270 {strides = array<i32>} : memref<2x32xf32, #tpu.memory_space<vmem>>, vector<2x32xf32>,
    return
  }
  func.func @transform_0(%arg0: i32, %arg1: i32) -> (i32, i32, i32) {
    %c0_i32 = arith.constant 0 : i32
    %c0_i32_0 = arith.constant 0 : i32
    return %arg1, %arg0, %c0_i32 : i32, i32, i32
  }
  func.func @transform_1(%arg0: i32, %arg1: i32) -> (i32, i32) {
    %c0_i32 = arith.constant 0 : i32
    %c0_i32_0 = arith.constant 0 : i32
    return %arg0, %c0_i32 : i32, i32
  }
  func.func @transform_2(%arg0: i32, %arg1: i32) -> (i32, i32) {
    %c0_i32 = arith.constant 0 : i32
    %c0_i32_0 = arith.constant 0 : i32
    %c0_i32_1 = arith.constant 0 : i32
    return %c0_i32, %c0_i32_0 : i32, i32
  }
  func.func @transform_3(%arg0: i32, %arg1: i32) -> (i32, i32) {
    %c0_i32 = arith.constant 0 : i32
    %c0_i32_0 = arith.constant 0 : i32
    %c0_i32_1 = arith.constant 0 : i32
    return %c0_i32, %c0_i32_0 : i32, i32
  }
  func.func @transform_4(%arg0: i32, %arg1: i32) -> (i32, i32) {
    %c0_i32 = arith.constant 0 : i32
    %c0_i32_0 = arith.constant 0 : i32
    %c0_i32_1 = arith.constant 0 : i32
    return %c0_i32, %c0_i32_0 : i32, i32
  }
  func.func @transform_5(%arg0: i32, %arg1: i32) -> (i32, i32) {
    %c0_i32 = arith.constant 0 : i32
    %c0_i32_0 = arith.constant 0 : i32
    return %arg0, %c0_i32 : i32, i32
  }
}

module attributes {stable_mosaic.version = 11 : i64} {
  func.func @_head_kernel(%arg0: memref<2x64xf32, #tpu.memory_space<vmem>>, %arg1: memref<2x64xf32, #tpu.memory_space<vmem>>, %arg2: memref<2x32xf32, #tpu.memory_space<vmem>>, %arg3: memref<64x32xbf16, #tpu.memory_space<vmem>>, %arg4: memref<64x32xbf16, #tpu.memory_space<vmem>>, %arg5: memref<1x32xf32, #tpu.memory_space<vmem>>, %arg6: memref<32x128xbf16, #tpu.memory_space<vmem>>, %arg7: memref<32x128xbf16, #tpu.memory_space<vmem>>, %arg8: memref<1x128xf32, #tpu.memory_space<vmem>>, %arg9: memref<2x128xf32, #tpu.memory_space<vmem>>) attributes {dimension_semantics = [], scalar_prefetch = 0 : i64, scratch_operands = 0 : i64, tpu.core_type = #tpu.core_type<tc>} {
    %c0 = arith.constant 0 : index
    %c0_0 = arith.constant 0 : index
    %0 = vector.load %arg0[%c0, %c0_0] : memref<2x64xf32, #tpu.memory_space<vmem>>, vector<2x64xf32>
    %1 = arith.truncf %0 : vector<2x64xf32> to vector<2x64xbf16>
    %c0_1 = arith.constant 0 : index
    %c0_2 = arith.constant 0 : index
    %2 = vector.load %arg3[%c0_1, %c0_2] : memref<64x32xbf16, #tpu.memory_space<vmem>>, vector<64x32xbf16>
    %cst = arith.constant dense<0.000000e+00> : vector<2x32xf32>
    %3 = tpu.matmul %1, %2, %cst {dimension_numbers = #tpu.dot_dimension_numbers<[1], [0], [0], [1], [0, 0, 1, 1], [], []>} : vector<2x64xbf16>, vector<64x32xbf16>, vector<2x32xf32> -> vector<2x32xf32>
    %c0_3 = arith.constant 0 : index
    %c0_4 = arith.constant 0 : index
    %4 = vector.load %arg1[%c0_3, %c0_4] : memref<2x64xf32, #tpu.memory_space<vmem>>, vector<2x64xf32>
    %5 = arith.truncf %4 : vector<2x64xf32> to vector<2x64xbf16>
    %c0_5 = arith.constant 0 : index
    %c0_6 = arith.constant 0 : index
    %6 = vector.load %arg4[%c0_5, %c0_6] : memref<64x32xbf16, #tpu.memory_space<vmem>>, vector<64x32xbf16>
    %cst_7 = arith.constant dense<0.000000e+00> : vector<2x32xf32>
    %7 = tpu.matmul %5, %6, %cst_7 {dimension_numbers = #tpu.dot_dimension_numbers<[1], [0], [0], [1], [0, 0, 1, 1], [], []>} : vector<2x64xbf16>, vector<64x32xbf16>, vector<2x32xf32> -> vector<2x32xf32>
    %8 = arith.addf %3, %7 : vector<2x32xf32>
    %c0_8 = arith.constant 0 : index
    %c0_9 = arith.constant 0 : index
    %9 = vector.load %arg5[%c0_8, %c0_9] : memref<1x32xf32, #tpu.memory_space<vmem>>, vector<1x32xf32>
    %10 = vector.broadcast %9 : vector<1x32xf32> to vector<2x32xf32>
    %11 = arith.addf %8, %10 : vector<2x32xf32>
    %12 = math.tanh %11 : vector<2x32xf32>
    %13 = arith.truncf %12 : vector<2x32xf32> to vector<2x32xbf16>
    %c0_10 = arith.constant 0 : index
    %c0_11 = arith.constant 0 : index
    %14 = vector.load %arg6[%c0_10, %c0_11] : memref<32x128xbf16, #tpu.memory_space<vmem>>, vector<32x128xbf16>
    %cst_12 = arith.constant dense<0.000000e+00> : vector<2x128xf32>
    %15 = tpu.matmul %13, %14, %cst_12 {dimension_numbers = #tpu.dot_dimension_numbers<[1], [0], [0], [1], [0, 0, 1, 1], [], []>} : vector<2x32xbf16>, vector<32x128xbf16>, vector<2x128xf32> -> vector<2x128xf32>
    %c0_13 = arith.constant 0 : index
    %c0_14 = arith.constant 0 : index
    %16 = vector.load %arg2[%c0_13, %c0_14] : memref<2x32xf32, #tpu.memory_space<vmem>>, vector<2x32xf32>
    %17 = arith.truncf %16 : vector<2x32xf32> to vector<2x32xbf16>
    %c0_15 = arith.constant 0 : index
    %c0_16 = arith.constant 0 : index
    %18 = vector.load %arg7[%c0_15, %c0_16] : memref<32x128xbf16, #tpu.memory_space<vmem>>, vector<32x128xbf16>
    %cst_17 = arith.constant dense<0.000000e+00> : vector<2x128xf32>
    %19 = tpu.matmul %17, %18, %cst_17 {dimension_numbers = #tpu.dot_dimension_numbers<[1], [0], [0], [1], [0, 0, 1, 1], [], []>} : vector<2x32xbf16>, vector<32x128xbf16>, vector<2x128xf32> -> vector<2x128xf32>
    %20 = arith.addf %15, %19 : vector<2x128xf32>
    %c0_18 = arith.constant 0 : index
    %c0_19 = arith.constant 0 : index
    %21 = vector.load %arg8[%c0_18, %c0_19] : memref<1x128xf32, #tpu.memory_space<vmem>>, vector<1x128xf32>
    %22 = vector.broadcast %21 : vector<1x128xf32> to vector<2x128xf32>
    %23 = arith.addf %20, %22 : vector<2x128xf32>
    %c0_20 = arith.constant 0 : index
    %c0_21 = arith.constant 0 : index
    %24 = vector.load %arg9[%c0_20, %c0_21] : memref<2x128xf32, #tpu.memory_space<vmem>>, vector<2x128xf32>
    tpu.vector_store %arg9[%c0_20, %c0_21], %23 {strides = array<i32>} : memref<2x128xf32, #tpu.memory_space<vmem>>, vector<2x128xf32>,
    return
  }
}

</mosaic_0001>

<bundles_post_ra>
// kernel: lstm_model_forward.4
= control target key start
LH: loop header
LB: loop body
LE: loop exit
PB: predicated region body
PF: predicated region fallthrough
CT: control target
= control target key end

     0   :  { %vm484_vm0 = vcmask 1045504   ;;  %v1206_v1 = vmov 0   ;;  %vm471_vm1 = vcmask 359424   ;;  %vm778_vm10 = vcmask 1046528   ;;  %s1603_s1 = inlined_call_operand.vmem [shape: bf16[300,384], index: 1, kind: input, shape index: {}]   ;;  %s1604_s0 = inlined_call_operand.vmem [shape: bf16[64,300], index: 0, kind: input, shape index: {}]   ;;  %s1605_s3 = inlined_call_operand.vmem [shape: s32[64,1], index: 3, kind: input, shape index: {}]   ;;  %s1606_s2 = inlined_call_operand.vmem [shape: f32[1,128], index: 2, kind: input, shape index: {}]   ;;  %s1607_s4 = inlined_call_operand.vmem [shape: f32[4,128], index: 4, kind: output, shape index: {}]  }
   0x1   :  { %v1114_v0 = vld [vmem:[%s1603_s1 + $0xac] ss:$12 sps:$4 sm:$0xff]   ;;  %599 = vmatprep.mubr.bf16.mxu1 %v1206_v1  ;;  %1112 = vset.pattern.permute.xlu0 %v1206_v1  ;;  %v1116_v2 = vld [vmem:[%s1603_s1 + $0x1b4] ss:$12 sps:$4 sm:$0x3f]  }
   0x2   :  { %1113 = vset.pattern.permute.xlu1 %v1206_v1  ;;  %494 = vmatprep.subr.bf16.mxu0 %v1114_v0  ;;  %v1118_v3 = vld [vmem:[%s1603_s1 + $0xa8] ss:$12 sps:$4 sm:$0xff]   ;;  %v1119_v4 = vld [vmem:[%s1603_s1 + $0x1b0] ss:$12 sps:$4 sm:$0x3f]  }
   0x3   :  { %1039 = vmatprep.subr.msk.bf16.mxu1 %vm484_vm0, %v1116_v2  ;;  %v1120_v5 = vld [vmem:[%s1603_s1 + $0x94] ss:$12 sps:$4 sm:$0xff]   ;;  %495 = vmatpush1.bf16.msra.mxu0 %v1118_v3  ;;  %v486_v6 = vsel %vm484_vm0, %v1119_v4, 0  ;;  %v1122_v7 = vld [vmem:[%s1603_s1 + $0x19c] ss:$12 sps:$4 sm:$0xff]  }
   0x4   :  { %v1124_v8 = vld [vmem:[%s1603_s1 + $0x90] ss:$12 sps:$4 sm:$0xff]   ;;  %578 = vmatpush1.bf16.msra.mxu1 %v486_v6  ;;  %496 = vmatprep.subr.bf16.mxu0 %v1120_v5  ;;  %v1125_v9 = vld [vmem:[%s1603_s1 + $0x198] ss:$12 sps:$4 sm:$0xff]   ;;  %v1131_v13 = vld [vmem:[%s1603_s1 + $0x180] ss:$12 sps:$4 sm:$0xff]  }
   0x5   :  { %579 = vmatprep.subr.bf16.mxu1 %v1122_v7  ;;  %v1126_v10 = vld [vmem:[%s1603_s1 + $0x7c] ss:$12 sps:$4 sm:$0xff]   ;;  %v1128_v11 = vld [vmem:[%s1603_s1 + $0x184] ss:$12 sps:$4 sm:$0xff]   ;;  %v1136_v17 = vld [vmem:[%s1603_s1 + $0x60] ss:$12 sps:$4 sm:$0xff]  }
   0x6   :  { %v1130_v12 = vld [vmem:[%s1603_s1 + $0x78] ss:$12 sps:$4 sm:$0xff]   ;;  %v1279_v15 = vld [vmem:[%s1604_s0 + $0x8] ss:$12 sps:$4 sm:$0xff]   ;;  %v1135_v16 = vld [vmem:[%s1603_s1 + $0x170] ss:$12 sps:$4 sm:$0xff]  }
   0x7   :  { %497 = vmatpush1.bf16.msra.mxu0 %v1124_v8  ;;  %v1132_v14 = vld [vmem:[%s1603_s1 + $0x64] ss:$12 sps:$4 sm:$0xff]   ;;  %v1138_v19 = vld [vmem:[%s1603_s1 + $0x4c] ss:$12 sps:$4 sm:$0xff]   ;;  %v1141_v21 = vld [vmem:[%s1603_s1 + $0x48] ss:$12 sps:$4 sm:$0xff]  }
   0x8   :  { %580 = vmatpush1.bf16.msra.mxu1 %v1125_v9  ;;  %498 = vmatprep.subr.bf16.mxu0 %v1126_v10  ;;  %v1137_v18 = vld [vmem:[%s1603_s1 + $0xb0] ss:$12 sps:$4 sm:$0xff]   ;;  %v1140_v20 = vld [vmem:[%s1603_s1 + $0x158] ss:$12 sps:$4 sm:$0xff]   ;;  %v1143_v23 = vld [vmem:[%s1603_s1 + $0x34] ss:$12 sps:$4 sm:$0xff]  }
   0x9   :  { %581 = vmatprep.subr.bf16.mxu1 %v1128_v11  ;;  %v1142_v22 = vld [vmem:[%s1603_s1 + $0x98] ss:$12 sps:$4 sm:$0xff]   ;;  %v1311_v24 = vld [vmem:[%s1604_s0 + $0x20] ss:$12 sps:$4 sm:$0xff]   ;;  %v1147_v26 = vld [vmem:[%s1603_s1 + $0x30] ss:$12 sps:$4 sm:$0xff]  }
   0xa   :  { %v1146_v25 = vld [vmem:[%s1603_s1 + $0x140] ss:$12 sps:$4 sm:$0xff]   ;;  %v1149_v28 = vld [vmem:[%s1603_s1 + $0x1c] ss:$12 sps:$4 sm:$0xff]   ;;  %v1152_v30 = vld [vmem:[%s1603_s1 + $0x18] ss:$12 sps:$4 sm:$0xff]  }
   0xb   :  { %499 = vmatpush1.bf16.msra.mxu0 %v1130_v12  ;;  %v1148_v27 = vld [vmem:[%s1603_s1 + $0x80] ss:$12 sps:$4 sm:$0xff]   ;;  %v1151_v29 = vld [vmem:[%s1603_s1 + $0x128] ss:$12 sps:$4 sm:$0xff]   ;;  %v1154_v32 = vld [vmem:[%s1603_s1 + $0x4] ss:$12 sps:$4 sm:$0xff]  }
   0xc   :  { %582 = vmatpush1.bf16.msra.mxu1 %v1131_v13  ;;  %500 = vmatprep.subr.bf16.mxu0 %v1132_v14  ;;  %v1153_v31 = vld [vmem:[%s1603_s1 + $0x68] ss:$12 sps:$4 sm:$0xff]   ;;  %v1157_v33 = vld [vmem:[%s1603_s1 + $0x110] ss:$12 sps:$4 sm:$0xff]   ;;  %v1346_v34 = vld [vmem:[%s1604_s0 + $0x38] ss:$12 sps:$4 sm:$0xff]  }
   0xd   :  { %1049 = vmatprep.subr.bf16.mxu1 %v1135_v16  ;;  %v1158_v35 = vld [vmem:[%s1603_s1] ss:$12 sps:$4 sm:$0xff]   ;;  %v1159_v36 = vld [vmem:[%s1603_s1 + $0x50] ss:$12 sps:$4 sm:$0xff]   ;;  %v1162_v38 = vld [vmem:[%s1603_s1 + $0xf8] ss:$12 sps:$4 sm:$0xff]  }
   0xe   :  { %v1160_v37 = vld [vmem:[%s1603_s1 + $0x16c] ss:$12 sps:$4 sm:$0xff]   ;;  %v1163_v39 = vld [vmem:[%s1603_s1 + $0x168] ss:$12 sps:$4 sm:$0xff]   ;;  %v1378_v43 = vld [vmem:[%s1604_s0 + $0x50] ss:$12 sps:$4 sm:$0xff]  }
   0xf   :  { %1040 = vmatmul.mubr.msk.bf16.vlgmr.msra.gmra.mxu1 %vm471_vm1, %v1279_v15  ;;  %501 = vmatpush1.bf16.msra.mxu0 %v1136_v17  ;;  %v1164_v40 = vld [vmem:[%s1603_s1 + $0x38] ss:$12 sps:$4 sm:$0xff]   ;;  %v1165_v41 = vld [vmem:[%s1603_s1 + $0x154] ss:$12 sps:$4 sm:$0xff]   ;;  %v1169_v44 = vld [vmem:[%s1603_s1 + $0x150] ss:$12 sps:$4 sm:$0xff]  }
  0x10   :  { %1050 = vmatpush3.bf16.msra.mxu1 %v1137_v18  ;;  %502 = vmatprep.subr.bf16.mxu0 %v1138_v19  ;;  %v1168_v42 = vld [vmem:[%s1603_s1 + $0xe0] ss:$12 sps:$4 sm:$0xff]   ;;  %v1171_v46 = vld [vmem:[%s1603_s1 + $0x13c] ss:$12 sps:$4 sm:$0xff]   ;;  %v1174_v48 = vld [vmem:[%s1603_s1 + $0x138] ss:$12 sps:$4 sm:$0xff]  }
  0x11   :  { %1051 = vmatprep.subr.bf16.mxu1 %v1140_v20  ;;  %609 = vmatprep.mubr.bf16.mxu1 %v1206_v1  ;;  %v1170_v45 = vld [vmem:[%s1603_s1 + $0x20] ss:$12 sps:$4 sm:$0xff]   ;;  %v1173_v47 = vld [vmem:[%s1603_s1 + $0xc8] ss:$12 sps:$4 sm:$0xff]   ;;  %v1178_v49 = vld [vmem:[%s1604_s0 + $0x4] ss:$12 sps:$4 sm:$0xff]  }
  0x12   :  { %v1175_v50 = vld [vmem:[%s1603_s1 + $0x8] ss:$12 sps:$4 sm:$0xff]   ;;  %v1179_v51 = vld [vmem:[%s1603_s1 + $0x124] ss:$12 sps:$4 sm:$0xff]   ;;  %v1409_v52 = vld [vmem:[%s1604_s0] ss:$12 sps:$4 sm:$0xff]   ;;  %526 = vmatprep.mubr.bf16.mxu0 %v1178_v49 }
  0x13   :  { %503 = vmatpush1.bf16.msra.mxu0 %v1141_v21  ;;  %v1184_v53 = vld [vmem:[%s1603_s1 + $0x1b8] ss:$12 sps:$4 sm:$0x3f]   ;;  %v1181_v54 = vld [vmem:[%s1603_s1 + $0x120] ss:$12 sps:$4 sm:$0xff]   ;;  %v860_v6 = vld [vmem:[%s1605_s3 + $0x10] sm:$0xff] }
  0x14   :  { %1052 = vmatpush3.bf16.msra.mxu1 %v1142_v22  ;;  %504 = vmatprep.subr.bf16.mxu0 %v1143_v23  ;;  %v1182_v55 = vld [vmem:[%s1603_s1 + $0x10c] ss:$12 sps:$4 sm:$0xff]   ;;  %v492_v56 = vsel %vm484_vm0, %v1184_v53, 0  ;;  %v1425_v57 = vld [vmem:[%s1604_s0 + $0x1c] ss:$12 sps:$4 sm:$0xff]   ;;  %v858_v4 = vld [vmem:[%s1605_s3] sm:$0xff] }
  0x15   :  { %1053 = vmatprep.subr.bf16.mxu1 %v1146_v25  ;;  %v1185_v58 = vld [vmem:[%s1603_s1 + $0x108] ss:$12 sps:$4 sm:$0xff]   ;;  %v1197_v60 = vld [vmem:[%s1603_s1 + $0x1a0] ss:$12 sps:$4 sm:$0xff]   ;;  %v1441_v61 = vld [vmem:[%s1604_s0 + $0x18] ss:$12 sps:$4 sm:$0xff]  }
  0x16   :  { %v1188_v59 = vld [vmem:[%s1603_s1 + $0xf4] ss:$12 sps:$4 sm:$0xff]   ;;  %v1191_v62 = vld [vmem:[%s1603_s1 + $0xf0] ss:$12 sps:$4 sm:$0xff]   ;;  %v859_v3 = vld [vmem:[%s1605_s3 + $0x8] sm:$0xff]  ;;  %vm866_vm3 = vcmp.gt.s32.totalorder %v858_v4, 0 }
  0x17   :  { %1041 = vmatmul.mubr.msk.bf16.gmra.mxu1 %vm471_vm1, %v1311_v24  ;;  %505 = vmatpush1.bf16.msra.mxu0 %v1147_v26  ;;  %v1192_v63 = vld [vmem:[%s1603_s1 + $0xdc] ss:$12 sps:$4 sm:$0xff]   ;;  %v1195_v0 = vld [vmem:[%s1604_s0 + $0x34] ss:$12 sps:$4 sm:$0xff]   ;;  %vm867_vm2 = vcmp.gt.s32.totalorder %v859_v3, 0  ;;  %v874_v9 = vsel %vm866_vm3, 1, %v1206_v1 }
  0x18   :  { %1054 = vmatpush3.bf16.msra.mxu1 %v1148_v27  ;;  %506 = vmatprep.subr.bf16.mxu0 %v1149_v28  ;;  %v1205_v2 = vld [vmem:[%s1603_s1 + $0x188] ss:$12 sps:$4 sm:$0xff]   ;;  %v861_v5 = vld [vmem:[%s1605_s3 + $0x18] sm:$0xff]  ;;  %v875_v7 = vsel %vm867_vm2, 1, %v1206_v1  ;;  %v1198_v10 = vld [vmem:[%s1603_s1 + $0xc4] ss:$12 sps:$4 sm:$0xff]  }
  0x19   :  { %1055 = vmatprep.subr.bf16.mxu1 %v1151_v29  ;;  %619 = vmatprep.mubr.bf16.mxu1 %v1206_v1  ;;  %v1194_v8 = vld [vmem:[%s1603_s1 + $0xd8] ss:$12 sps:$4 sm:$0xff]   ;;  %vm869_vm4 = vcmp.gt.s32.totalorder %v861_v5, 0  ;;  %vm868_vm5 = vcmp.gt.s32.totalorder %v860_v6, 0  ;;  %v863_v11 = vld [vmem:[%s1605_s3 + $0x28] sm:$0xff]  ;;  %v864_v20 = vld [vmem:[%s1605_s3 + $0x30] sm:$0xff] }
  0x1a   :  { %886 = vperm.xlu0 %1112, %v875_v7   ;;  %v862_v12 = vld [vmem:[%s1605_s3 + $0x20] sm:$0xff]  ;;  %883 = vperm.xlu1 %1113, %v874_v9   ;;  %v877_v13 = vsel %vm869_vm4, 1, %v1206_v1  ;;  %v1200_v14 = vld [vmem:[%s1604_s0 + $0x30] ss:$12 sps:$4 sm:$0xff]   ;;  %v876_v17 = vsel %vm868_vm5, 1, %v1206_v1  ;;  %vm871_vm6 = vcmp.gt.s32.totalorder %v863_v11, 0 }
  0x1b   :  { %507 = vmatpush1.bf16.msra.mxu0 %v1152_v30  ;;  %v1201_v16 = vld [vmem:[%s1603_s1 + $0xc0] ss:$12 sps:$4 sm:$0xff]   ;;  %vm870_vm7 = vcmp.gt.s32.totalorder %v862_v12, 0  ;;  %v865_v19 = vld [vmem:[%s1605_s3 + $0x38] sm:$0xff]  ;;  %v879_v21 = vsel %vm871_vm6, 1, %v1206_v1  ;;  %vm872_vm9 = vcmp.gt.s32.totalorder %v864_v20, 0 }
  0x1c   :  { %1056 = vmatpush3.bf16.msra.mxu1 %v1153_v31  ;;  %508 = vmatprep.subr.bf16.mxu0 %v1154_v32  ;;  %v1202_v18 = vld [vmem:[%s1604_s0 + $0x4c] ss:$12 sps:$4 sm:$0xff]   ;;  %v878_v22 = vsel %vm870_vm7, 1, %v1206_v1  ;;  %vm873_vm8 = vcmp.gt.s32.totalorder %v865_v19, 0  ;;  %v1204_v25 = vld [vmem:[%s1604_s0 + $0x48] ss:$12 sps:$4 sm:$0xff]  }
  0x1d   :  { %1057 = vmatprep.subr.bf16.mxu1 %v1157_v33  ;;  %v881_v23 = vsel %vm873_vm8, 1, %v1206_v1  ;;  %v880_v26 = vsel %vm872_vm9, 1, %v1206_v1  ;;  %vm958_vm3 = vcmask 1041409   ;;  %vm960_vm5 = vcmask 1042434  }
  0x1e   :  { %892 = vperm.xlu0 %1112, %v877_v13   ;;  %889 = vperm.xlu1 %1113, %v876_v17   ;;  %vm962_vm6 = vcmask 1043459  }
  0x1f   :  { %1042 = vmatmul.mubr.msk.bf16.gmra.mxu1 %vm471_vm1, %v1346_v34  ;;  %509 = vmatpush1.bf16.msra.mxu0 %v1158_v35 }
  0x20   :  { %1058 = vmatpush3.bf16.msra.mxu1 %v1159_v36  ;;  %510 = vmatprep.subr.bf16.mxu0 %v1160_v37 }
  0x21   :  { %1059 = vmatprep.subr.bf16.mxu1 %v1162_v38  ;;  %629 = vmatprep.mubr.bf16.mxu1 %v1206_v1 }
  0x22   :  { %898 = vperm.xlu0 %1112, %v879_v21   ;;  %895 = vperm.xlu1 %1113, %v878_v22  }
  0x23   :  { %511 = vmatpush2.bf16.msra.mxu0 %v1163_v39 }
  0x24   :  { %1060 = vmatpush3.bf16.msra.mxu1 %v1164_v40  ;;  %512 = vmatprep.subr.bf16.mxu0 %v1165_v41 }
  0x25   :  { %1061 = vmatprep.subr.bf16.mxu1 %v1168_v42 }
  0x26   :  { %904 = vperm.xlu0 %1112, %v881_v23   ;;  %901 = vperm.xlu1 %1113, %v880_v26  }
  0x27   :  { %1043 = vmatmul.mubr.msk.bf16.gmra.mxu1 %vm471_vm1, %v1378_v43  ;;  %513 = vmatpush2.bf16.msra.mxu0 %v1169_v44 }
  0x28   :  { %1062 = vmatpush3.bf16.msra.mxu1 %v1170_v45  ;;  %514 = vmatprep.subr.bf16.mxu0 %v1171_v46 }
  0x29   :  { %1063 = vmatprep.subr.bf16.mxu1 %v1173_v47  ;;  %672 = vmatprep.mubr.bf16.mxu1 %v1178_v49 }
  0x2b   :  { %515 = vmatpush2.bf16.msra.mxu0 %v1174_v48 }
  0x2c   :  { %1064 = vmatpush3.bf16.msra.mxu1 %v1175_v50  ;;  %516 = vmatprep.subr.bf16.mxu0 %v1179_v51 }
  0x2d   :  { %1110 = vmatprep.subr.msk.bf16.mxu1 %vm484_vm0, %v1184_v53 }
  0x2f   :  { %673 = vmatmul.mubr.bf16.vlgmr.msra.gmra.mxu1 %v1409_v52  ;;  %517 = vmatpush2.bf16.msra.mxu0 %v1181_v54 }
  0x30   :  { %518 = vmatprep.subr.bf16.mxu0 %v1182_v55  ;;  %1097 = vmatpush3.bf16.msra.mxu1 %v492_v56 }
  0x31   :  { %680 = vmatprep.mubr.bf16.mxu1 %v1425_v57  ;;  %1098 = vmatprep.subr.bf16.mxu1 %v1197_v60 }
  0x33   :  { %519 = vmatpush2.bf16.msra.mxu0 %v1185_v58 }
  0x34   :  { %520 = vmatprep.subr.bf16.mxu0 %v1188_v59  ;;  %1099 = vmatpush3.bf16.msra.mxu1 %v1197_v60 }
  0x35   :  { %1100 = vmatprep.subr.bf16.mxu1 %v1205_v2 }
  0x37   :  { %681 = vmatmul.mubr.bf16.gmra.mxu1 %v1441_v61  ;;  %521 = vmatpush2.bf16.msra.mxu0 %v1191_v62 }
  0x38   :  { %522 = vmatprep.subr.bf16.mxu0 %v1192_v63  ;;  %688 = vmatprep.mubr.bf16.mxu1 %v1195_v0 }
  0x39   :  { %1101 = vmatpush3.bf16.msra.mxu1 %v1205_v2 }
  0x3b   :  { %523 = vmatpush2.bf16.msra.mxu0 %v1194_v8 }
  0x3c   :  { %524 = vmatprep.subr.bf16.mxu0 %v1198_v10 }
  0x3f   :  { %689 = vmatmul.mubr.bf16.gmra.mxu1 %v1200_v14  ;;  %525 = vmatpush2.bf16.msra.mxu0 %v1201_v16 }
  0x40   :  { %696 = vmatprep.mubr.bf16.mxu1 %v1202_v18 }
  0x42   :  { %527 = vmatmul.mubr.bf16.vlgmr.msra.gmra.mxu0 %v1409_v52 }
  0x43   :  { %536 = vmatprep.mubr.bf16.mxu0 %v1425_v57 }
  0x47   :  { %697 = vmatmul.mubr.bf16.gmra.mxu1 %v1204_v25 }
  0x48   :  { %1102 = vmatprep.mubr.msk.bf16.mxu1 %vm471_vm1, %v1279_v15 }
  0x4a   :  { %537 = vmatmul.mubr.bf16.gmra.mxu0 %v1441_v61 }
  0x4b   :  { %546 = vmatprep.mubr.bf16.mxu0 %v1195_v0 }
  0x4f   :  { %1103 = vmatmul.mubr.msk.bf16.vlgmr.msra.gmra.mxu1 %vm471_vm1, %v1311_v24 }
  0x50   :  { %1106 = vmatprep.mubr.msk.bf16.mxu1 %vm471_vm1, %v1346_v34 }
  0x52   :  { %547 = vmatmul.mubr.bf16.gmra.mxu0 %v1200_v14 }
  0x53   :  { %556 = vmatprep.mubr.bf16.mxu0 %v1202_v18 }
  0x57   :  { %1107 = vmatmul.mubr.msk.bf16.gmra.mxu1 %vm471_vm1, %v1378_v43 }
  0x5a   :  { %557 = vmatmul.mubr.bf16.gmra.mxu0 %v1204_v25 }
  0x95   :  { %v1548_v11 = vpop.permute.xlu0 %886  ;;  %v1550_v14 = vpop.permute.xlu1 %883 }
  0x96   :  { %vm907_vm11 = vcmp.eq.s32.totalorder %v1548_v11, 1  ;;  %vm906_vm12 = vcmp.eq.s32.totalorder %v1550_v14, 1 }
  0xcf   :  { %v601_v1 = vpop.f32.mrf.mxu1 }
  0xd1   :  { %v603_v27 = vpop.f32.mrf.mxu1 }
  0xd3   :  { %v605_v28 = vpop.f32.mrf.mxu1 }
  0xd5   :  { %v607_v29 = vpop.f32.mrf.mxu1 }
  0xd7   :  { %v1517_v15 = vpop.f32.mrf.mxu1 }
  0xd9   :  { %v613_v30 = vpop.f32.mrf.mxu1 }
  0xdb   :  { %v615_v31 = vpop.f32.mrf.mxu1 }
  0xdd   :  { %v617_v32 = vpop.f32.mrf.mxu1 }
  0xdf   :  { %v1519_v33 = vpop.f32.mrf.mxu1 }
  0xe1   :  { %v1521_v24 = vpop.f32.mrf.mxu1 }
  0xe3   :  { %v1523_v34 = vpop.f32.mrf.mxu1 }
  0xe5   :  { %v1525_v35 = vpop.f32.mrf.mxu1 }
  0xe7   :  { %v1527_v36 = vpop.f32.mrf.mxu1 }
  0xe9   :  { %v1529_v37 = vpop.f32.mrf.mxu1 }
  0xeb   :  { %v1531_v38 = vpop.f32.mrf.mxu1 }
  0xed   :  { %v1533_v39 = vpop.f32.mrf.mxu1 }
  0xef   :  { %v1065_v40 = vpop.f32.mrf.mxu1 }
  0xf1   :  { %v1066_v41 = vpop.f32.mrf.mxu1 }
  0xf2   :  { %v1067_v16 = vadd.f32 %v1066_v41, %v1065_v40  ;;  %v893_v40 = vpop.permute.xlu0 %892 }
  0xf3   :  { %v1068_v42 = vpop.f32.mrf.mxu1  ;;  %vm909_vm13 = vcmp.eq.s32.totalorder %v893_v40, 1 }
  0xf5   :  { %v1069_v43 = vpop.f32.mrf.mxu1 }
  0xf7   :  { %v1071_v44 = vpop.f32.mrf.mxu1 }
  0xf9   :  { %v1072_v45 = vpop.f32.mrf.mxu1 }
  0xfa   :  { %v1073_v12 = vadd.f32 %v1072_v45, %v1071_v44 }
  0xfb   :  { %v1074_v46 = vpop.f32.mrf.mxu1 }
  0xfd   :  { %v1075_v47 = vpop.f32.mrf.mxu1 }
  0xfe   :  { %v1076_v19 = vadd.f32 %v1075_v47, %v1074_v46 }
  0xff   :  { %v1535_v48 = vpop.f32.mrf.mxu1 }
 0x101   :  { %v1537_v49 = vpop.f32.mrf.mxu1 }
 0x102   :  { %v528_v50 = vpop.f32.mrf.mxu0 }
 0x103   :  { %v1539_v51 = vpop.f32.mrf.mxu1  ;;  %v602_v2 = vadd.f32 %v601_v1, %v528_v50 }
 0x104   :  { %v530_v52 = vpop.f32.mrf.mxu0 }
 0x105   :  { %v1541_v53 = vpop.f32.mrf.mxu1  ;;  %v604_v55 = vadd.f32 %v603_v27, %v530_v52  ;;  %v1070_v27 = vadd.f32 %v1069_v43, %v1068_v42 }
 0x106   :  { %v532_v54 = vpop.f32.mrf.mxu0 }
 0x107   :  { %v1543_v56 = vpop.f32.mrf.mxu1  ;;  %v779_v61 = vrot.slane %v604_v55, 1  ;;  %v606_v62 = vadd.f32 %v605_v28, %v532_v54 }
 0x108   :  { %v534_v57 = vpop.f32.mrf.mxu0 }
 0x109   :  { %v608_v58 = vadd.f32 %v607_v29, %v534_v57  ;;  %v1545_v59 = vpop.f32.mrf.mxu1 }
 0x10a   :  { %v538_v60 = vpop.f32.mrf.mxu0 }
 0x10b   :  { %v780_v63 = vrot.slane %v608_v58, 1  ;;  %v1086_v0 = vpop.f32.mrf.mxu1  ;;  %v612_v28 = vadd.f32 %v1517_v15, %v538_v60  ;;  %v1559_v15 = vld [vmem:[%s1606_s2] ss:$0 sm:$0xff] }
 0x10c   :  { %v540_v3 = vpop.f32.mrf.mxu0 }
 0x10d   :  { %v781_v4 = vsel %vm778_vm10, %v779_v61, %v780_v63  ;;  %v800_v5 = vadd.f32 %v780_v63, %v606_v62  ;;  %v1087_v6 = vpop.f32.mrf.mxu1  ;;  %v614_v9 = vadd.f32 %v613_v30, %v540_v3  ;;  %v1079_v61 = vadd.f32 %v1537_v49, %v1535_v48 }
 0x10e   :  { %v799_v7 = vadd.f32 %v781_v4, %v602_v2  ;;  %v542_v8 = vpop.f32.mrf.mxu0  ;;  %v1082_v62 = vadd.f32 %v1541_v53, %v1539_v51  ;;  %v1085_v4 = vadd.f32 %v1545_v59, %v1543_v56 }
 0x10f   :  { %v1104_v10 = vpop.f32.mrf.mxu1  ;;  %v782_v22 = vrot.slane %v614_v9, 1  ;;  %v616_v23 = vadd.f32 %v615_v31, %v542_v8  ;;  %v890_v31 = vpop.permute.xlu1 %889 }
 0x110   :  { %v544_v13 = vpop.f32.mrf.mxu0  ;;  %v748_v20 = vadd.f32 %v1104_v10, %v1073_v12  ;;  %vm908_vm14 = vcmp.eq.s32.totalorder %v890_v31, 1  ;;  %v1088_v12 = vadd.f32 %v1087_v6, %v1086_v0 }
 0x111   :  { %v618_v17 = vadd.f32 %v617_v32, %v544_v13  ;;  %v739_v18 = vpop.f32.mrf.mxu1 }
 0x112   :  { %v548_v21 = vpop.f32.mrf.mxu0  ;;  %v740_v26 = vadd.f32 %v1067_v16, %v739_v18  ;;  %v818_v41 = vrot.slane %v748_v20, 2 }
 0x113   :  { %v783_v25 = vrot.slane %v618_v17, 1  ;;  %v1105_v1 = vpop.f32.mrf.mxu1  ;;  %v622_v51 = vadd.f32 %v1519_v33, %v548_v21  ;;  %v899_v21 = vpop.permute.xlu0 %898 }
 0x114   :  { %v751_v29 = vadd.f32 %v1105_v1, %v1076_v19  ;;  %v550_v30 = vpop.f32.mrf.mxu0  ;;  %v815_v54 = vrot.slane %v740_v26, 2  ;;  %vm911_vm15 = vcmp.eq.s32.totalorder %v899_v21, 1 }
 0x115   :  { %v784_v44 = vsel %vm778_vm10, %v782_v22, %v783_v25  ;;  %v802_v45 = vadd.f32 %v783_v25, %v616_v23  ;;  %v742_v32 = vpop.f32.mrf.mxu1  ;;  %v624_v57 = vadd.f32 %v1521_v24, %v550_v30 }
 0x116   :  { %v801_v46 = vadd.f32 %v784_v44, %v612_v28  ;;  %v819_v47 = vrot.slane %v751_v29, 2  ;;  %v743_v50 = vadd.f32 %v1070_v27, %v742_v32  ;;  %v552_v52 = vpop.f32.mrf.mxu0 }
 0x117   :  { %v1108_v42 = vpop.f32.mrf.mxu1  ;;  %v785_v53 = vrot.slane %v624_v57, 1  ;;  %v626_v0 = vadd.f32 %v1523_v34, %v552_v52 }
 0x118   :  { %v820_v43 = vsel %vm484_vm0, %v818_v41, %v819_v47  ;;  %v838_v55 = vadd.f32 %v819_v47, %v802_v45  ;;  %v816_v58 = vrot.slane %v743_v50, 2  ;;  %v554_v60 = vpop.f32.mrf.mxu0  ;;  %v764_v26 = vadd.f32 %v1108_v42, %v1085_v4 }
 0x119   :  { %v837_v63 = vadd.f32 %v820_v43, %v801_v46  ;;  %v628_v2 = vadd.f32 %v1525_v35, %v554_v60  ;;  %v755_v3 = vpop.f32.mrf.mxu1  ;;  %v896_v46 = vpop.permute.xlu1 %895 }
 0x11a   :  { %v817_v8 = vsel %vm484_vm0, %v815_v54, %v816_v58  ;;  %v836_v9 = vadd.f32 %v816_v58, %v800_v5  ;;  %v853_v24 = vadd.f32 %v1559_v15, %v838_v55  ;;  %v558_v10 = vpop.f32.mrf.mxu0  ;;  %v756_v20 = vadd.f32 %v1079_v61, %v755_v3  ;;  %v905_v3 = vpop.permute.xlu0 %904 }
 0x11b   :  { %v835_v13 = vadd.f32 %v817_v8, %v799_v7  ;;  %v852_v48 = vadd.f32 %v1559_v15, %v837_v63  ;;  %v786_v49 = vrot.slane %v628_v2, 1  ;;  %v1109_v16 = vpop.f32.mrf.mxu1  ;;  %v632_v45 = vadd.f32 %v1527_v36, %v558_v10 }
 0x11c   :  { %v851_v35 = vadd.f32 %v1559_v15, %v836_v9  ;;  %v917_v17 = vsel %vm909_vm13, %v853_v24, -1e+30  ;;  %v560_v56 = vpop.f32.mrf.mxu0  ;;  %v767_v1 = vadd.f32 %v1109_v16, %v1088_v12  ;;  %v821_v41 = vrot.slane %v756_v20, 2 }
 0x11d   :  { %v850_v59 = vadd.f32 %v1559_v15, %v835_v13  ;;  %v930_v5 = vsel %vm484_vm0, %v917_v17, -inf  ;;  %v916_v18 = vsel %vm908_vm14, %v852_v48, -1e+30  ;;  %v758_v6 = vpop.f32.mrf.mxu1  ;;  %v787_v33 = vsel %vm778_vm10, %v785_v53, %v786_v49  ;;  %v902_v10 = vpop.permute.xlu1 %901 }
 0x11e   :  { %v915_v7 = vsel %vm907_vm11, %v851_v35, -1e+30  ;;  %v931_v19 = vmax.f32 %v916_v18, %v930_v5  ;;  %v562_v22 = vpop.f32.mrf.mxu0  ;;  %v634_v28 = vadd.f32 %v1529_v37, %v560_v56  ;;  %v759_v11 = vadd.f32 %v1082_v62, %v758_v6 }
 0x11f   :  { %v914_v23 = vsel %vm906_vm12, %v850_v59, -1e+30  ;;  %v922_v25 = vsel %vm484_vm0, %v915_v7, -inf  ;;  %v803_v30 = vadd.f32 %v787_v33, %v622_v51  ;;  %v804_v44 = vadd.f32 %v786_v49, %v626_v0 }
 0x120   :  { %v923_v27 = vmax.f32 %v914_v23, %v922_v25  ;;  %v932_v34 = vrot.slane %v931_v19, 4  ;;  %v564_v29 = vpop.f32.mrf.mxu0  ;;  %v822_v47 = vrot.slane %v759_v11, 2  ;;  %v825_v50 = vrot.slane %v767_v1, 2 }
 0x121   :  { %v638_v32 = vadd.f32 %v1533_v39, %v564_v29  ;;  %v788_v31 = vrot.slane %v634_v28, 1  ;;  %v636_v52 = vadd.f32 %v1531_v38, %v562_v22  ;;  %v824_v57 = vrot.slane %v764_v26, 2 }
 0x122   :  { %v924_v40 = vrot.slane %v923_v27, 4  ;;  %v933_v14 = vmax.f32 %v931_v19, %v932_v34  ;;  %v823_v43 = vsel %vm484_vm0, %v821_v41, %v822_v47  ;;  %v840_v55 = vadd.f32 %v822_v47, %v804_v44 }
 0x123   :  { %v789_v54 = vrot.slane %v638_v32, 1  ;;  %v839_v58 = vadd.f32 %v823_v43, %v803_v30  ;;  %vm910_vm1 = vcmp.eq.s32.totalorder %v896_v46, 1  ;;  %v826_v2 = vsel %vm484_vm0, %v824_v57, %v825_v50 }
 0x124   :  { %v925_v42 = vmax.f32 %v923_v27, %v924_v40  ;;  %v934_v37 = vrot.slane %v933_v14, 2  ;;  %v855_v62 = vadd.f32 %v1559_v15, %v840_v55  ;;  %vm913_vm2 = vcmp.eq.s32.totalorder %v905_v3, 1 }
 0x125   :  { %v790_v36 = vsel %vm778_vm10, %v788_v31, %v789_v54  ;;  %v806_v39 = vadd.f32 %v789_v54, %v636_v52  ;;  %v854_v38 = vadd.f32 %v1559_v15, %v839_v58  ;;  %vm912_vm4 = vcmp.eq.s32.totalorder %v902_v10, 1 }
 0x126   :  { %v926_v60 = vrot.slane %v925_v42, 2  ;;  %v935_v61 = vmax.f32 %v933_v14, %v934_v37  ;;  %v805_v63 = vadd.f32 %v790_v36, %v632_v45  ;;  %v919_v24 = vsel %vm911_vm15, %v855_v62, -1e+30 }
 0x127   :  { %v842_v4 = vadd.f32 %v825_v50, %v806_v39  ;;  %v918_v13 = vsel %vm910_vm1, %v854_v38, -1e+30  ;;  %v938_v48 = vsel %vm484_vm0, %v919_v24, -inf }
 0x128   :  { %v927_v8 = vmax.f32 %v925_v42, %v926_v60  ;;  %v936_v9 = vrot.slane %v935_v61, 1  ;;  %v841_v12 = vadd.f32 %v826_v2, %v805_v63  ;;  %v939_v51 = vmax.f32 %v918_v13, %v938_v48 }
 0x129   :  { %v857_v49 = vadd.f32 %v1559_v15, %v842_v4 }
 0x12a   :  { %v928_v16 = vrot.slane %v927_v8, 1  ;;  %v856_v53 = vadd.f32 %v1559_v15, %v841_v12  ;;  %v937_v35 = vmax.f32 %v935_v61, %v936_v9  ;;  %v940_v59 = vrot.slane %v939_v51, 4 }
 0x12b   :  { %v921_v17 = vsel %vm913_vm2, %v857_v49, -1e+30 }
 0x12c   :  { %v929_v56 = vmax.f32 %v927_v8, %v928_v16  ;;  %v920_v5 = vsel %vm912_vm4, %v856_v53, -1e+30  ;;  %v946_v18 = vsel %vm484_vm0, %v921_v17, -inf  ;;  %v941_v7 = vmax.f32 %v939_v51, %v940_v59 }
 0x12d   :  { %v947_v0 = vmax.f32 %v920_v5, %v946_v18 }
 0x12e   :  { %v959_v6 = vsel %vm958_vm3, %v937_v35, %v929_v56  ;;  %v942_v33 = vrot.slane %v941_v7, 2 }
 0x12f   :  { %v948_v19 = vrot.slane %v947_v0, 4 }
 0x130   :  { %v943_v21 = vmax.f32 %v941_v7, %v942_v33 }
 0x131   :  { %v949_v20 = vmax.f32 %v947_v0, %v948_v19 }
 0x132   :  { %v944_v23 = vrot.slane %v943_v21, 1 }
 0x133   :  { %v950_v22 = vrot.slane %v949_v20, 2 }
 0x134   :  { %v945_v15 = vmax.f32 %v943_v21, %v944_v23 }
 0x135   :  { %v951_v25 = vmax.f32 %v949_v20, %v950_v22 }
 0x136   :  { %v961_v27 = vsel %vm960_vm5, %v945_v15, %v959_v6 }
 0x137   :  { %v952_v26 = vrot.slane %v951_v25, 1 }
 0x139   :  { %v953_v1 = vmax.f32 %v951_v25, %v952_v26 }
 0x13b   :  { %v963_v34 = vsel %vm962_vm6, %v953_v1, %v961_v27 }
 0x13c   :  { %965 = vst [vmem:[%s1607_s4] sm:$0xf] %v963_v34 }

// kernel: lstm_model_forward.5
= control target key start
LH: loop header
LB: loop body
LE: loop exit
PB: predicated region body
PF: predicated region fallthrough
CT: control target
= control target key end

     0   :  { %v456_v1 = vmov 0.0   ;;  %vm457_vm0 = vmmov 0   ;;  %s569_s0 = inlined_call_operand.vmem [shape: f32[2,64], index: 0, kind: input, shape index: {}]   ;;  %s570_s1 = inlined_call_operand.vmem [shape: f32[2,64], index: 1, kind: input, shape index: {}]   ;;  %s571_s2 = inlined_call_operand.vmem [shape: f32[2,32], index: 2, kind: input, shape index: {}]   ;;  %s572_s3 = inlined_call_operand.vmem [shape: bf16[64,32], index: 3, kind: input, shape index: {}]   ;;  %s573_s4 = inlined_call_operand.vmem [shape: bf16[64,32], index: 4, kind: input, shape index: {}]   ;;  %s574_s5 = inlined_call_operand.vmem [shape: f32[1,32], index: 5, kind: input, shape index: {}]   ;;  %s575_s6 = inlined_call_operand.vmem [shape: bf16[32,128], index: 6, kind: input, shape index: {}]   ;;  %s576_s7 = inlined_call_operand.vmem [shape: bf16[32,128], index: 7, kind: input, shape index: {}]   ;;  %s577_s8 = inlined_call_operand.vmem [shape: f32[1,128], index: 8, kind: input, shape index: {}]   ;;  %s578_s9 = inlined_call_operand.hbm [shape: f32[2,128], index: 9, kind: output, shape index: {}]  }
   0x1   :  { %v420_v0 = vld [vmem:[%s573_s4 + $0x18] sm:$0xff]   ;;  %377 = vmatprep.subr.bf16.mxu0 %v456_v1  ;;  %389 = vmatprep.subr.bf16.mxu1 %v456_v1  ;;  %v422_v3 = vld [vmem:[%s573_s4 + $0x10] sm:$0xff]   ;;  %v424_v5 = vld [vmem:[%s573_s4 + $0x8] sm:$0xff]  }
   0x2   :  { %v421_v2 = vld [vmem:[%s572_s3 + $0x18] sm:$0xff]   ;;  %378 = vmatpush3.bf16.msra.mxu0 %v420_v0  ;;  %385 = vmatprep.mubr.msk.bf16.mxu0 %vm457_vm0, %v456_v1  ;;  %v423_v4 = vld [vmem:[%s572_s3 + $0x10] sm:$0xff]   ;;  %v425_v6 = vld [vmem:[%s572_s3 + $0x8] sm:$0xff]  }
   0x3   :  { %390 = vmatpush3.bf16.msra.mxu1 %v421_v2  ;;  %379 = vmatprep.subr.bf16.mxu0 %v456_v1  ;;  %v426_v7 = vld [vmem:[%s573_s4] sm:$0xff]  }
   0x4   :  { %391 = vmatprep.subr.bf16.mxu1 %v456_v1  ;;  %397 = vmatprep.mubr.msk.bf16.mxu1 %vm457_vm0, %v456_v1  ;;  %v44_v8 = vld [vmem:[%s570_s1] sm:$0x3] }
   0x5   :  { %v427_v9 = vld [vmem:[%s572_s3] sm:$0xff]  }
   0x6   :  { %380 = vmatpush3.bf16.msra.mxu0 %v422_v3  ;;  %v34_v10 = vld [vmem:[%s569_s0] sm:$0x3] }
   0x7   :  { %392 = vmatpush3.bf16.msra.mxu1 %v423_v4  ;;  %381 = vmatprep.subr.bf16.mxu0 %v456_v1 }
   0x8   :  { %393 = vmatprep.subr.bf16.mxu1 %v456_v1 }
   0xa   :  { %382 = vmatpush3.bf16.msra.mxu0 %v424_v5 }
   0xb   :  { %394 = vmatpush3.bf16.msra.mxu1 %v425_v6  ;;  %383 = vmatprep.subr.bf16.mxu0 %v456_v1 }
   0xc   :  { %14 = vsyncpa [#allocation3], 0  ;;  %395 = vmatprep.subr.bf16.mxu1 %v456_v1  ;;  %v45_v11 = vpack.c.bf16 %v44_v8, %v44_v8  ;;  %vm78_vm1 = vcmask 523264   ;;  %v35_v12 = vpack.c.bf16 %v34_v10, %v34_v10  ;;  %v428_v13 = vld [vmem:[%s576_s7 + $0x8] sm:$0xff]   ;;  %v429_v14 = vld [vmem:[%s576_s7] sm:$0xff]   ;;  %vm221_vm2 = vcmask 261120  }
   0xd   :  { %v430_v15 = vld [vmem:[%s575_s6 + $0x8] sm:$0xff]   ;;  %v203_v16 = vld [vmem:[%s571_s2] sm:$0x3] }
   0xe   :  { %384 = vmatpush3.bf16.msra.mxu0 %v426_v7  ;;  %v204_v17 = vpack.c.bf16 %v203_v16, %v203_v16  ;;  %v431_v18 = vld [vmem:[%s575_s6] sm:$0xff]   ;;  %s458_s6 = smov [#allocation2]  }
   0xf   :  { %396 = vmatpush3.bf16.msra.mxu1 %v427_v9  ;;  %401 = vmatprep.subr.bf16.mxu0 %v456_v1  ;;  %v353_v21 = vld [vmem:[%s574_s5] ss:$0 sm:$0xff]  ;;  %s335_s15 = sshll.u32 %s458_s6, 4  ;;  %s336_s15 = int_to_ptr.vmem [resolvable:$true] %s335_s15 }
  0x10   :  { %409 = vmatprep.subr.bf16.mxu1 %v456_v1  ;;  %v360_v37 = vld [vmem:[%s577_s8] ss:$0 sm:$0xff]  ;;  %s434_s16 = scalar_lea.vmem %s336_s15, 32  ;;  %p439_p1 = scmp.lt.s32.totalorder %s336_s15, %s336_s15 }
  0x11   :  { %386 = vmatmul.mubr.msk.bf16.vlgmr.msra.gmra.mxu0 %vm78_vm1, %v45_v11  ;;  %p435_p0 = scmp.ne.s32.totalorder %s336_s15, %s434_s16  ;;  %p440_p2 = scmp.lt.s32.totalorder %s434_s16, %s434_s16 }
  0x12   :  { %398 = vmatmul.mubr.msk.bf16.vlgmr.msra.gmra.mxu1 %vm78_vm1, %v35_v12  ;;  %405 = vmatprep.mubr.msk.bf16.mxu0 %vm457_vm0, %v456_v1 }
  0x13   :  { %413 = vmatprep.mubr.msk.bf16.mxu1 %vm457_vm0, %v456_v1  ;;  %402 = vmatpush3.bf16.msra.mxu0 %v428_v13  ;;  %p441_p3 = por %p440_p2, %p439_p1 }
  0x14   :  { %403 = vmatprep.subr.bf16.mxu0 %v456_v1  ;;  %410 = vmatpush3.bf16.msra.mxu1 %v430_v15 }
  0x15   :  { %411 = vmatprep.subr.bf16.mxu1 %v456_v1  ;;  %p442_p4 = pnand %p441_p3, %p435_p0 }
  0x17   :  { %404 = vmatpush3.bf16.msra.mxu0 %v429_v14 }
  0x18   :  { %412 = vmatpush3.bf16.msra.mxu1 %v431_v18 }
  0x1a   :  { %406 = vmatmul.mubr.msk.bf16.vlgmr.msra.gmra.mxu0 %vm221_vm2, %v204_v17 }
  0xd1   :  { %v116_v19 = vpop.f32.mrf.mxu0 }
  0xd2   :  { %v183_v20 = vpop.f32.mrf.mxu1 }
  0xd3   :  { %v184_v22 = vadd.f32 %v183_v20, %v116_v19  ;;  %v387_v23 = vpop.f32.mrf.mxu0 }
  0xd4   :  { %v399_v24 = vpop.f32.mrf.mxu1 }
  0xd5   :  { %v196_v25 = vadd.f32 %v353_v21, %v184_v22  ;;  %v119_v26 = vpop.f32.mrf.mxu0 }
  0xd6   :  { %v186_v27 = vpop.f32.mrf.mxu1 }
  0xd7   :  { %432 = vtanh.f32 %v196_v25  ;;  %v388_v28 = vpop.f32.mrf.mxu0 }
  0xd8   :  { %v400_v29 = vpop.f32.mrf.mxu1 }
  0xda   :  { %v259_v32 = vpop.f32.mrf.mxu0 }
  0xdc   :  { %v407_v33 = vpop.f32.mrf.mxu0 }
  0xde   :  { %v262_v34 = vpop.f32.mrf.mxu0 }
  0xe0   :  { %v408_v35 = vpop.f32.mrf.mxu0 }
  0xe4   :  { %v433_v30 = vpop.eup %432 }
  0xe5   :  { %v198_v31 = vpack.c.bf16 %v433_v30, %v433_v30 }
  0xe7   :  { %414 = vmatmul.mubr.msk.bf16.vlgmr.msra.gmra.mxu1 %vm221_vm2, %v198_v31 }
 0x1a7   :  { %v314_v36 = vpop.f32.mrf.mxu1 }
 0x1a8   :  { %v315_v38 = vadd.f32 %v314_v36, %v259_v32 }
 0x1a9   :  { %v415_v39 = vpop.f32.mrf.mxu1 }
 0x1aa   :  { %v327_v40 = vadd.f32 %v360_v37, %v315_v38 }
 0x1ab   :  { %v317_v41 = vpop.f32.mrf.mxu1 }
 0x1ac   :  { %328 = vst [vmem:[#allocation2] sm:$0x3] %v327_v40 }
 0x1ad   :  { %v416_v42 = vpop.f32.mrf.mxu1 }
 0x1ae   :  { %445 = shalt.err (!%p442_p4)
}
 0x1af   :  { %338 = dma.vmem_to_hbm [thread:$0]  %s336_s15, 32, %s578_s9, [#allocation3]  }
 0x1b0   :  { %454 = dma.done.wait [#allocation3], 32  }
 0x1b1   :  { %455 = vsyncadd [#allocation3], 4294967264 }
 0x1b2   :  { %342 = vsyncpa [#allocation3], 1 }

// kernel: lstm_model_forward.3
= control target key start
LH: loop header
LB: loop body
LE: loop exit
PB: predicated region body
PF: predicated region fallthrough
CT: control target
= control target key end

     0   :  { %s2751_s18 = smov 0   ;;  %s2753_s19 = smov 0   ;;  %s3449_s0 = inlined_call_operand.vmem [shape: bf16[16,2,300], index: 0, kind: input, shape index: {}]   ;;  %s3450_s1 = inlined_call_operand.vmem [shape: s32[2,1], index: 1, kind: input, shape index: {}]   ;;  %s3451_s2 = inlined_call_operand.vmem [shape: bf16[300,128], index: 2, kind: input, shape index: {}]   ;;  %s3452_s3 = inlined_call_operand.vmem [shape: bf16[32,128], index: 3, kind: input, shape index: {}]   ;;  %s3453_s4 = inlined_call_operand.vmem [shape: f32[1,128], index: 4, kind: input, shape index: {}]   ;;  %s3454_s5 = inlined_call_operand.vmem [shape: f32[2,32], index: 5, kind: output, shape index: {}]  }
   0x1   :  { %s2755_s20 = smov 0  }
   0x2 LB: > { %s24_s21 = sadd.s32 1, %s2707_s19  ;;  %p2103_p0 = scmp.ge.s32.totalorder %s2711_s20, 1  ;;  %s2711_s20 = sphi %s2755_s20, %s15_s20   ;;  %s2707_s19 = sphi %s2753_s19, %s3456_s19   ;;  %s2703_s18 = sphi %s2751_s18, %s3455_s18  }
   0x3   : > { %p25_p1 = scmp.ge.s32.totalorder %s24_s21, 2  ;;  %p215_p2 = scmp.lt.s32.totalorder %s2711_s20, 3 }
   0x5   : > { %s3458_s21 = smov (%p25_p1, %s24_s21), 0  ;;  %p216_p3 = pnand %p2103_p0, %p215_p2 }
   0x6   : > { %s2769_s22 = sshll.u32 (!%p216_p3), %s2703_s18, 3  ;;  %p2105_p5 = scmp.ne.s32.totalorder (!%p216_p3), %s2703_s18, 0 }
   0x7   : > { %219 = sbr.rel (%p216_p3) target bundleno = 5596 (0x15dc), region = 40  ;;  %p251_p4 = scmp.lt.s32.totalorder (!%p216_p3), %s2769_s22, 15 }
   0xc   : > { %s252_s23 = scalar_select %p251_p4, %s2769_s22, 15 }
   0xd   : > { %272 = sbr.rel (%p2105_p5) target bundleno = 20 (0x14), region = 44 }
   0xe   : > { %s2547_s24 = smul.u32 3, %s252_s23 }
  0x10   : > { %s2776_s27 = scalar_lea.vmem %s3449_s0, %s2547_s24 }
  0x12   : > { %vm273_vm0 = vcmask 254976   ;;  %v2713_v0 = vmov 0.0  }
  0x13   : > { %274 = vst.msk [vmem:[#allocation2] sm:$0x3] %vm273_vm0, %v2713_v0  ;;  %275 = vst.msk [vmem:[#allocation3] sm:$0x3] %vm273_vm0, %v2713_v0 }
  0x14 PF: > { %v2781_v1 = vld [vmem:[%s3451_s2 + $0x78] sm:$0xff]   ;;  %v2714_v3 = vmov 0.0   ;;  %v2793_v4 = vld [vmem:[%s3451_s2 + $0x70] sm:$0xff]   ;;  %vm2715_vm1 = vmmov 0   ;;  %v2807_v6 = vld [vmem:[%s3451_s2 + $0x68] sm:$0xff]   ;;  %vm473_vm2 = vcmask 1045504   ;;  %v342_v15 = vlaneseq }
  0x15   : > { %v2786_v2 = vld [vmem:[%s3451_s2 + $0x38] sm:$0xff]   ;;  %2403 = vmatprep.subr.bf16.mxu1 %v2714_v3  ;;  %2171 = vmatprep.subr.bf16.mxu0 %v2781_v1  ;;  %v2799_v5 = vld [vmem:[%s3451_s2 + $0x30] sm:$0xff]   ;;  %v2812_v7 = vld [vmem:[%s3451_s2 + $0x28] sm:$0xff]   ;;  %v2716_v19 = vmov 1966171168   ;;  %vm469_vm3 = vcmask 359424   ;;  %v643_v61 = vstv %s2769_s22 }
  0x16   : > { %2172 = vmatpush3.bf16.msra.mxu0 %v2786_v2  ;;  %2409 = vmatprep.mubr.msk.bf16.mxu1 %vm2715_vm1, %v2714_v3  ;;  %v2818_v8 = vld [vmem:[%s3451_s2 + $0x60] sm:$0xff]   ;;  %v2590_v9 = vld [vmem:[%s3451_s2 + $0x90] sm:$0x3f]   ;;  %v2836_v12 = vld [vmem:[%s3451_s2 + $0x88] sm:$0xff]   ;;  %v340_v20 = vunpack.c.l.s4 %v2716_v19  ;;  %v343_v21 = vshrl.u32 %v342_v15, 7  ;;  %vm570_vm4 = vcmask 261120  }
  0x17   : > { %2173 = vmatprep.subr.bf16.mxu0 %v2793_v4  ;;  %v2827_v10 = vld [vmem:[%s3451_s2 + $0x20] sm:$0xff]   ;;  %v2829_v11 = vsel %vm473_vm2, %v2590_v9, 0  ;;  %v2842_v13 = vld [vmem:[%s3451_s2 + $0x58] sm:$0xff]   ;;  %v2861_v17 = vld [vmem:[%s3451_s2 + $0x50] sm:$0xff]   ;;  %v2717_v54 = vmov 0   ;;  %s2718_s7 = smov 32  }
  0x18   : > { %2404 = vmatpush3.bf16.msra.mxu1 %v2829_v11  ;;  %v2848_v14 = vld [vmem:[%s3451_s2 + $0x18] sm:$0xff]   ;;  %v2855_v16 = vld [vmem:[%s3451_s2 + $0x80] sm:$0xff]   ;;  %v2869_v22 = vld [vmem:[%s3451_s2 + $0x10] sm:$0xff]   ;;  %v341_v24 = vunpack.c.0.s8 %v340_v20  ;;  %2580 = vset.pattern.permute.xlu1 %v2717_v54  ;;  %s2719_s10 = smov 64   ;;  %s839_s11 = sadd.s32 1, %s2769_s22 }
  0x19   : > { %2405 = vmatprep.subr.bf16.mxu1 %v2714_v3  ;;  %v2108_v18 = vld.sshfl [vmem:[%s2776_s27] sm:$0x13 pattern:$0x75316420]  ;;  %v2876_v23 = vld [vmem:[%s3451_s2 + $0x48] sm:$0xff]   ;;  %2581 = vset.pattern.permute.xlu0 %v2717_v54  ;;  %s1032_s12 = sadd.s32 2, %s2769_s22 }
  0x1a   : > { %2174 = vmatpush3.bf16.msra.mxu0 %v2799_v5  ;;  %v338_v25 = vcombine.high %v2108_v18, %v2108_v18  ;;  %v2879_v26 = vsub.s32 %v341_v24, %v343_v21  ;;  %v2885_v27 = vld [vmem:[%s3451_s2 + $0x8] sm:$0xff]   ;;  %v2892_v29 = vld [vmem:[%s3451_s2 + $0x40] sm:$0xff]   ;;  %s1225_s13 = sadd.s32 3, %s2769_s22  ;;  %s1418_s14 = sadd.s32 4, %s2769_s22 }
  0x1b   : > { %2175 = vmatprep.subr.bf16.mxu0 %v2807_v6  ;;  %v2898_v31 = vld [vmem:[%s3452_s3 + $0x8] sm:$0xff]   ;;  %v2904_v33 = vld [vmem:[%s3451_s2] sm:$0xff]   ;;  %s1611_s23 = sadd.s32 5, %s2769_s22  ;;  %s1804_s24 = sadd.s32 6, %s2769_s22 }
  0x1c   : > { %2406 = vmatpush3.bf16.msra.mxu1 %v2836_v12  ;;  %v345_v28 = vrot.slane %v2108_v18, %v2879_v26  ;;  %v352_v30 = vrot.slane %v338_v25, %v2879_v26  ;;  %v2912_v34 = vld [vmem:[%s3452_s3] sm:$0xff]   ;;  %s1997_s26 = sadd.s32 7, %s2769_s22  ;;  %s2720_s22 = smov 96  }
  0x1d   : > { %2407 = vmatprep.subr.bf16.mxu1 %v2714_v3  ;;  %v2916_v35 = vld [vmem:[#allocation2] sm:$0x3]  ;;  %v322_v56 = vld [vmem:[#allocation3] sm:$0x3] }
  0x1e   : > { %2176 = vmatpush3.bf16.msra.mxu0 %v2812_v7  ;;  %v353_v32 = vcombine.high %v345_v28, %v345_v28  ;;  %509 = vmatprep.mubr.bf16.mxu0 %v352_v30  ;;  %v557_v36 = vpack.c.bf16 %v2916_v35, %v2916_v35  ;;  %v2953_v42 = vld [vmem:[%s3453_s4] ss:$0 sm:$0xff]  ;;  %v2134_v21 = vld.sshfl [vmem:[%s2776_s27 + $0x3] sm:$0x13 pattern:$0x75316420] }
  0x1f   : > { %2177 = vmatprep.subr.bf16.mxu0 %v2818_v8  ;;  %v2963_v60 = vld [vmem:[%s3450_s1] sm:$0x3]  ;;  %v666_v24 = vcombine.high %v2134_v21, %v2134_v21  ;;  %v673_v25 = vrot.slane %v2134_v21, %v2879_v26 }
  0x20   : > { %2408 = vmatpush3.bf16.msra.mxu1 %v2855_v16  ;;  %vm644_vm5 = vcmp.lt.s32.totalorder %v643_v61, %v2963_v60  ;;  %v840_v61 = vstv %s839_s11 }
  0x21   : > { %2413 = vmatprep.subr.bf16.mxu1 %v2714_v3  ;;  %v645_v9 = vsel %vm644_vm5, 1, %v2717_v54  ;;  %v681_v30 = vcombine.high %v673_v25, %v673_v25  ;;  %vm841_vm7 = vcmp.lt.s32.totalorder %v840_v61, %v2963_v60 }
  0x22   : > { %2178 = vmatpush3.bf16.msra.mxu0 %v2827_v10 }
  0x23   : > { %2179 = vmatprep.subr.bf16.mxu0 %v2842_v13  ;;  %2410 = vmatmul.mubr.msk.bf16.vlgmr.msra.gmra.mxu1 %vm469_vm3, %v353_v32 }
  0x24   : > { %2414 = vmatpush3.bf16.msra.mxu1 %v2898_v31  ;;  %2417 = vmatprep.mubr.msk.bf16.mxu1 %vm2715_vm1, %v2714_v3 }
  0x25   : > { %2415 = vmatprep.subr.bf16.mxu1 %v2714_v3 }
  0x26   : > { %2180 = vmatpush3.bf16.msra.mxu0 %v2848_v14 }
  0x27   : > { %2181 = vmatprep.subr.bf16.mxu0 %v2861_v17 }
  0x28   : > { %2416 = vmatpush3.bf16.msra.mxu1 %v2912_v34 }
  0x29   : > { %2200 = vmatprep.subr.bf16.mxu1 %v2781_v1 }
  0x2a   : > { %2182 = vmatpush3.bf16.msra.mxu0 %v2869_v22 }
  0x2b   : > { %2183 = vmatprep.subr.bf16.mxu0 %v2876_v23  ;;  %2418 = vmatmul.mubr.msk.bf16.vlgmr.msra.gmra.mxu1 %vm570_vm4, %v557_v36 }
  0x2c   : > { %2201 = vmatpush3.bf16.msra.mxu1 %v2786_v2 }
  0x2d   : > { %2202 = vmatprep.subr.bf16.mxu1 %v2793_v4 }
  0x2e   : > { %2184 = vmatpush3.bf16.msra.mxu0 %v2885_v27 }
  0x2f   : > { %2185 = vmatprep.subr.bf16.mxu0 %v2892_v29 }
  0x30   : > { %2203 = vmatpush3.bf16.msra.mxu1 %v2799_v5 }
  0x31   : > { %2204 = vmatprep.subr.bf16.mxu1 %v2807_v6 }
  0x32   : > { %2186 = vmatpush3.bf16.msra.mxu0 %v2904_v33 }
  0x33   : > { %2421 = vmatprep.subr.bf16.mxu0 %v2714_v3 }
  0x34   : > { %2205 = vmatpush3.bf16.msra.mxu1 %v2812_v7 }
  0x35   : > { %510 = vmatmul.mubr.bf16.vlgmr.msra.gmra.mxu0 %v345_v28  ;;  %2206 = vmatprep.subr.bf16.mxu1 %v2818_v8  ;;  %v680_v28 = vrot.slane %v666_v24, %v2879_v26 }
  0x36   : > { %2422 = vmatpush3.bf16.msra.mxu0 %v2829_v11  ;;  %2427 = vmatprep.mubr.msk.bf16.mxu0 %vm2715_vm1, %v2714_v3 }
  0x37   : > { %2423 = vmatprep.subr.bf16.mxu0 %v2714_v3  ;;  %719 = vmatprep.mubr.bf16.mxu1 %v680_v28 }
  0x38   : > { %2207 = vmatpush3.bf16.msra.mxu1 %v2827_v10 }
  0x39   : > { %2208 = vmatprep.subr.bf16.mxu1 %v2842_v13 }
  0x3a   : > { %2424 = vmatpush3.bf16.msra.mxu0 %v2836_v12 }
  0x3b   : > { %2425 = vmatprep.subr.bf16.mxu0 %v2714_v3 }
  0x3c   : > { %2209 = vmatpush3.bf16.msra.mxu1 %v2848_v14 }
  0x3d   : > { %2210 = vmatprep.subr.bf16.mxu1 %v2861_v17 }
  0x3e   : > { %2426 = vmatpush3.bf16.msra.mxu0 %v2855_v16 }
  0x3f   : > { %2431 = vmatprep.subr.bf16.mxu0 %v2714_v3 }
  0x40   : > { %2211 = vmatpush3.bf16.msra.mxu1 %v2869_v22 }
  0x41   : > { %2212 = vmatprep.subr.bf16.mxu1 %v2876_v23  ;;  %2428 = vmatmul.mubr.msk.bf16.vlgmr.msra.gmra.mxu0 %vm469_vm3, %v681_v30 }
  0x42   : > { %2432 = vmatpush3.bf16.msra.mxu0 %v2898_v31  ;;  %2435 = vmatprep.mubr.msk.bf16.mxu0 %vm2715_vm1, %v2714_v3 }
  0x43   : > { %2433 = vmatprep.subr.bf16.mxu0 %v2714_v3 }
  0x44   : > { %2213 = vmatpush3.bf16.msra.mxu1 %v2885_v27 }
  0x45   : > { %2214 = vmatprep.subr.bf16.mxu1 %v2892_v29 }
  0x46   : > { %2434 = vmatpush3.bf16.msra.mxu0 %v2912_v34 }
  0x47   : > { %2229 = vmatprep.subr.bf16.mxu0 %v2781_v1 }
  0x48   : > { %2215 = vmatpush3.bf16.msra.mxu1 %v2904_v33 }
  0x49   : > { %2439 = vmatprep.subr.bf16.mxu1 %v2714_v3 }
  0x4b   : > { %720 = vmatmul.mubr.bf16.vlgmr.msra.gmra.mxu1 %v673_v25 }
  0x4c   : > { %2440 = vmatpush3.bf16.msra.mxu1 %v2829_v11  ;;  %2445 = vmatprep.mubr.msk.bf16.mxu1 %vm2715_vm1, %v2714_v3 }
  0x4d   : > { %2441 = vmatprep.subr.bf16.mxu1 %v2714_v3 }
  0x50   : > { %2442 = vmatpush3.bf16.msra.mxu1 %v2836_v12 }
  0x51   : > { %2443 = vmatprep.subr.bf16.mxu1 %v2714_v3 }
  0x54   : > { %2444 = vmatpush3.bf16.msra.mxu1 %v2855_v16 }
  0x55   : > { %2449 = vmatprep.subr.bf16.mxu1 %v2714_v3 }
  0xe3   : > { %v551_v37 = vpop.f32.mrf.mxu1 }
  0xe5   : > { %v2411_v38 = vpop.f32.mrf.mxu1 }
  0xe7   : > { %v554_v39 = vpop.f32.mrf.mxu1 }
  0xe9   : > { %v2412_v41 = vpop.f32.mrf.mxu1 }
  0xeb   : > { %v608_v44 = vpop.f32.mrf.mxu1 }
  0xed   : > { %v2419_v47 = vpop.f32.mrf.mxu1 }
  0xef   : > { %v611_v50 = vpop.f32.mrf.mxu1 }
  0xf1   : > { %v2420_v52 = vpop.f32.mrf.mxu1 }
  0xf5   : > { %v2187_v40 = vpop.f32.mrf.mxu0 }
  0xf7   : > { %v2188_v43 = vpop.f32.mrf.mxu0 }
  0xf8   : > { %v2189_v45 = vadd.f32 %v2188_v43, %v2187_v40 }
  0xf9   : > { %v2190_v46 = vpop.f32.mrf.mxu0 }
  0xfa   : > { %v512_v48 = vadd.f32 %v2189_v45, %v2953_v42 }
  0xfb   : > { %v2191_v49 = vpop.f32.mrf.mxu0 }
  0xfc   : > { %v552_v51 = vadd.f32 %v551_v37, %v512_v48 }
  0xfe   : > { %v614_v53 = vadd.f32 %v608_v44, %v552_v51 }
 0x100   : > { %2603 = vtanh.f32 %v614_v53  ;;  %v2132_v57 = vmul.f32 -1.442695, %v614_v53 }
 0x101   : > { %v761_v41 = vpop.f32.mrf.mxu0 }
 0x102   : > { %2605 = vpow2.f32 %v2132_v57 }
 0x103   : > { %v2429_v44 = vpop.f32.mrf.mxu0 }
 0x105   : > { %v764_v47 = vpop.f32.mrf.mxu0 }
 0x107   : > { %v2430_v50 = vpop.f32.mrf.mxu0 }
 0x10b   : > { %v2216_v43 = vpop.f32.mrf.mxu1 }
 0x10d   : > { %v2604_v55 = vpop.eup %2603  ;;  %v2217_v45 = vpop.f32.mrf.mxu1 }
 0x10e   : > { %628 = vrot.lane.b32.xlu0 %v2604_v55, %s2718_s7  ;;  %v2218_v46 = vadd.f32 %v2217_v45, %v2216_v43 }
 0x10f   : > { %v2606_v58 = vpop.eup %2605  ;;  %v2219_v48 = vpop.f32.mrf.mxu1 }
 0x110   : > { %v618_v59 = vadd.f32 1.0, %v2606_v58  ;;  %v722_v49 = vadd.f32 %v2218_v46, %v2953_v42 }
 0x111   : > { %v2220_v51 = vpop.f32.mrf.mxu1 }
 0x112   : > { %623 = vrot.lane.b32.xlu0 %v322_v56, %s2718_s7  ;;  %2607 = vrcp.f32 %v618_v59  ;;  %v762_v52 = vadd.f32 %v761_v41, %v722_v49 }
 0x11f   : > { %v2608_v62 = vpop.eup %2607 }
 0x180   : > { %v629_v63 = vpop.permute.xlu0 %628 }
 0x181   : > { %v631_v0 = vmul.f32 %v2608_v62, %v629_v63  ;;  %v842_v63 = vsel %vm841_vm7, 1, %v2717_v54 }
 0x183   : > { %633 = vrot.lane.b32.xlu1 %v631_v0, %s2718_s7 }
 0x184   : > { %v2971_v15 = vpop.permute.xlu0 %623 }
 0x185   : > { %v626_v18 = vmul.f32 %v2608_v62, %v2971_v15 }
 0x187   : > { %647 = vperm.xlu1 %2580, %v645_v9  }
 0x18b   : > { %651 = vrot.lane.b32.xlu1 %v2916_v35, %s2719_s10 }
 0x1f5   : > { %v634_v19 = vpop.permute.xlu1 %633 }
 0x1f6   : > { %v2974_v20 = vadd.f32 %v634_v19, %v626_v18 }
 0x1f8   : > { %2609 = vtanh.f32 %v2974_v20 }
 0x202   : > { %v648_v35 = vpop.permute.xlu1 %647 }
 0x203   : > { %vm649_vm6 = vcmp.eq.s32.totalorder %v648_v35, 1 }
 0x204   : > { %v3028_v25 = vsel %vm649_vm6, %v2974_v20, %v2971_v15 }
 0x205   : > { %v2610_v32 = vpop.eup %2609 }
 0x206   : > { %639 = vrot.lane.b32.xlu0 %v2610_v32, %s2718_s7  ;;  %v652_v37 = vpop.permute.xlu1 %651 }
 0x278   : > { %v640_v36 = vpop.permute.xlu0 %639 }
 0x279   : > { %v642_v38 = vmul.f32 %v2608_v62, %v640_v36  ;;  %v2139_v36 = vld.sshfl [vmem:[%s2776_s27 + $0x6] sm:$0x13 pattern:$0x75316420] }
 0x27b   : > { %v2997_v39 = vsel %vm649_vm6, %v642_v38, %v652_v37  ;;  %v859_v37 = vcombine.high %v2139_v36, %v2139_v36  ;;  %v866_v38 = vrot.slane %v2139_v36, %v2879_v26 }
 0x27c   : > { %v767_v40 = vpack.c.bf16 %v2997_v39, %v2997_v39 }
 0x27d   : > { %v874_v41 = vcombine.high %v866_v38, %v866_v38 }
 0x27e   : > { %769 = vrot.lane.b32.xlu0 %v767_v40, %s2719_s10  ;;  %v873_v40 = vrot.slane %v859_v37, %v2879_v26 }
 0x27f   : > { %2446 = vmatmul.mubr.msk.bf16.vlgmr.msra.gmra.mxu1 %vm469_vm3, %v874_v41 }
 0x280   : > { %2450 = vmatpush3.bf16.msra.mxu1 %v2898_v31  ;;  %2453 = vmatprep.mubr.msk.bf16.mxu1 %vm2715_vm1, %v2714_v3 }
 0x281   : > { %2451 = vmatprep.subr.bf16.mxu1 %v2714_v3 }
 0x284   : > { %2452 = vmatpush3.bf16.msra.mxu1 %v2912_v34 }
 0x285   : > { %2258 = vmatprep.subr.bf16.mxu1 %v2781_v1 }
 0x2f0   : > { %v770_v53 = vpop.permute.xlu0 %769 }
 0x2f1   : > { %2436 = vmatmul.mubr.msk.bf16.vlgmr.msra.gmra.mxu0 %vm570_vm4, %v770_v53 }
 0x2f2   : > { %2230 = vmatpush3.bf16.msra.mxu0 %v2786_v2  ;;  %912 = vmatprep.mubr.bf16.mxu0 %v873_v40 }
 0x2f3   : > { %2231 = vmatprep.subr.bf16.mxu0 %v2793_v4 }
 0x2f6   : > { %2232 = vmatpush3.bf16.msra.mxu0 %v2799_v5 }
 0x2f7   : > { %2233 = vmatprep.subr.bf16.mxu0 %v2807_v6 }
 0x2fa   : > { %2234 = vmatpush3.bf16.msra.mxu0 %v2812_v7 }
 0x2fb   : > { %2235 = vmatprep.subr.bf16.mxu0 %v2818_v8 }
 0x2fe   : > { %2236 = vmatpush3.bf16.msra.mxu0 %v2827_v10 }
 0x2ff   : > { %2237 = vmatprep.subr.bf16.mxu0 %v2842_v13 }
 0x302   : > { %2238 = vmatpush3.bf16.msra.mxu0 %v2848_v14 }
 0x303   : > { %2239 = vmatprep.subr.bf16.mxu0 %v2861_v17 }
 0x306   : > { %2240 = vmatpush3.bf16.msra.mxu0 %v2869_v22 }
 0x307   : > { %2241 = vmatprep.subr.bf16.mxu0 %v2876_v23 }
 0x30a   : > { %2242 = vmatpush3.bf16.msra.mxu0 %v2885_v27 }
 0x30b   : > { %2243 = vmatprep.subr.bf16.mxu0 %v2892_v29 }
 0x30e   : > { %2244 = vmatpush3.bf16.msra.mxu0 %v2904_v33 }
 0x30f   : > { %2457 = vmatprep.subr.bf16.mxu0 %v2714_v3 }
 0x311   : > { %913 = vmatmul.mubr.bf16.vlgmr.msra.gmra.mxu0 %v866_v38 }
 0x312   : > { %2458 = vmatpush3.bf16.msra.mxu0 %v2829_v11  ;;  %2463 = vmatprep.mubr.msk.bf16.mxu0 %vm2715_vm1, %v2714_v3 }
 0x313   : > { %2459 = vmatprep.subr.bf16.mxu0 %v2714_v3 }
 0x316   : > { %2460 = vmatpush3.bf16.msra.mxu0 %v2836_v12 }
 0x317   : > { %2461 = vmatprep.subr.bf16.mxu0 %v2714_v3 }
 0x31a   : > { %2462 = vmatpush3.bf16.msra.mxu0 %v2855_v16 }
 0x31b   : > { %2467 = vmatprep.subr.bf16.mxu0 %v2714_v3 }
 0x33f   : > { %v954_v46 = vpop.f32.mrf.mxu1 }
 0x341   : > { %v2447_v48 = vpop.f32.mrf.mxu1 }
 0x343   : > { %v957_v51 = vpop.f32.mrf.mxu1 }
 0x3b1   : > { %v808_v55 = vpop.f32.mrf.mxu0 }
 0x3b2   : > { %v814_v56 = vadd.f32 %v808_v55, %v762_v52  ;;  %v2448_v55 = vpop.f32.mrf.mxu1 }
 0x3b3   : > { %v2437_v57 = vpop.f32.mrf.mxu0 }
 0x3b4   : > { %2611 = vtanh.f32 %v814_v56  ;;  %v2137_v0 = vmul.f32 -1.442695, %v814_v56 }
 0x3b5   : > { %v811_v58 = vpop.f32.mrf.mxu0 }
 0x3b6   : > { %2613 = vpow2.f32 %v2137_v0  ;;  %v1033_v0 = vstv %s1032_s12 }
 0x3b7   : > { %v2438_v59 = vpop.f32.mrf.mxu0  ;;  %vm1034_vm9 = vcmp.lt.s32.totalorder %v1033_v0, %v2963_v60 }
 0x3c1   : > { %v2612_v62 = vpop.eup %2611 }
 0x3c2   : > { %824 = vrot.lane.b32.xlu1 %v2612_v62, %s2718_s7 }
 0x3c3   : > { %v2614_v9 = vpop.eup %2613 }
 0x3c4   : > { %v818_v18 = vadd.f32 1.0, %v2614_v9 }
 0x3c6   : > { %844 = vperm.xlu1 %2580, %v842_v63   ;;  %2615 = vrcp.f32 %v818_v18  ;;  %v1035_v18 = vsel %vm1034_vm9, 1, %v2717_v54 }
 0x3d1   : > { %v2245_v47 = vpop.f32.mrf.mxu0 }
 0x3d3   : > { %v2616_v19 = vpop.eup %2615  ;;  %v2246_v49 = vpop.f32.mrf.mxu0 }
 0x3d4   : > { %v822_v28 = vmul.f32 %v2616_v19, %v3028_v25  ;;  %v2247_v50 = vadd.f32 %v2246_v49, %v2245_v47 }
 0x3d5   : > { %v2248_v52 = vpop.f32.mrf.mxu0 }
 0x3d6   : > { %v915_v53 = vadd.f32 %v2247_v50, %v2953_v42 }
 0x3d7   : > { %v2249_v56 = vpop.f32.mrf.mxu0 }
 0x3d8   : > { %v955_v57 = vadd.f32 %v954_v46, %v915_v53 }
 0x434   : > { %v825_v21 = vpop.permute.xlu1 %824 }
 0x435   : > { %v827_v24 = vmul.f32 %v2616_v19, %v825_v21 }
 0x437   : > { %829 = vrot.lane.b32.xlu0 %v827_v24, %s2718_s7 }
 0x441   : > { %v845_v20 = vpop.permute.xlu1 %844 }
 0x442   : > { %vm846_vm8 = vcmp.eq.s32.totalorder %v845_v20, 1 }
 0x4a9   : > { %v830_v30 = vpop.permute.xlu0 %829 }
 0x4aa   : > { %v3031_v32 = vadd.f32 %v830_v30, %v822_v28 }
 0x4ac   : > { %2617 = vtanh.f32 %v3031_v32  ;;  %v3086_v37 = vsel %vm846_vm8, %v3031_v32, %v3028_v25 }
 0x4b9   : > { %v2618_v15 = vpop.eup %2617 }
 0x4ba   : > { %835 = vrot.lane.b32.xlu0 %v2618_v15, %s2718_s7  ;;  %v2144_v15 = vld.sshfl [vmem:[%s2776_s27 + $0x9] sm:$0x13 pattern:$0x75316420] }
 0x52c   : > { %v836_v35 = vpop.permute.xlu0 %835 }
 0x52d   : > { %v838_v43 = vmul.f32 %v2616_v19, %v836_v35  ;;  %v1052_v35 = vcombine.high %v2144_v15, %v2144_v15 }
 0x52f   : > { %v3055_v44 = vsel %vm846_vm8, %v838_v43, %v2997_v39  ;;  %v1059_v43 = vrot.slane %v2144_v15, %v2879_v26 }
 0x530   : > { %v960_v45 = vpack.c.bf16 %v3055_v44, %v3055_v44 }
 0x531   : > { %v1067_v46 = vcombine.high %v1059_v43, %v1059_v43 }
 0x532   : > { %962 = vrot.lane.b32.xlu1 %v960_v45, %s2719_s10  ;;  %v1066_v45 = vrot.slane %v1052_v35, %v2879_v26 }
 0x533   : > { %2464 = vmatmul.mubr.msk.bf16.vlgmr.msra.gmra.mxu0 %vm469_vm3, %v1067_v46 }
 0x534   : > { %2468 = vmatpush3.bf16.msra.mxu0 %v2898_v31  ;;  %2471 = vmatprep.mubr.msk.bf16.mxu0 %vm2715_vm1, %v2714_v3 }
 0x535   : > { %2469 = vmatprep.subr.bf16.mxu0 %v2714_v3 }
 0x538   : > { %2470 = vmatpush3.bf16.msra.mxu0 %v2912_v34 }
 0x539   : > { %2287 = vmatprep.subr.bf16.mxu0 %v2781_v1 }
 0x5a4   : > { %v963_v58 = vpop.permute.xlu1 %962 }
 0x5a5   : > { %2454 = vmatmul.mubr.msk.bf16.vlgmr.msra.gmra.mxu1 %vm570_vm4, %v963_v58 }
 0x5a6   : > { %2259 = vmatpush3.bf16.msra.mxu1 %v2786_v2  ;;  %1105 = vmatprep.mubr.bf16.mxu1 %v1066_v45 }
 0x5a7   : > { %2260 = vmatprep.subr.bf16.mxu1 %v2793_v4 }
 0x5aa   : > { %2261 = vmatpush3.bf16.msra.mxu1 %v2799_v5 }
 0x5ab   : > { %2262 = vmatprep.subr.bf16.mxu1 %v2807_v6 }
 0x5ae   : > { %2263 = vmatpush3.bf16.msra.mxu1 %v2812_v7 }
 0x5af   : > { %2264 = vmatprep.subr.bf16.mxu1 %v2818_v8 }
 0x5b2   : > { %2265 = vmatpush3.bf16.msra.mxu1 %v2827_v10 }
 0x5b3   : > { %2266 = vmatprep.subr.bf16.mxu1 %v2842_v13 }
 0x5b6   : > { %2267 = vmatpush3.bf16.msra.mxu1 %v2848_v14 }
 0x5b7   : > { %2268 = vmatprep.subr.bf16.mxu1 %v2861_v17 }
 0x5ba   : > { %2269 = vmatpush3.bf16.msra.mxu1 %v2869_v22 }
 0x5bb   : > { %2270 = vmatprep.subr.bf16.mxu1 %v2876_v23 }
 0x5be   : > { %2271 = vmatpush3.bf16.msra.mxu1 %v2885_v27 }
 0x5bf   : > { %2272 = vmatprep.subr.bf16.mxu1 %v2892_v29 }
 0x5c2   : > { %2273 = vmatpush3.bf16.msra.mxu1 %v2904_v33 }
 0x5c3   : > { %2475 = vmatprep.subr.bf16.mxu1 %v2714_v3 }
 0x5c5   : > { %1106 = vmatmul.mubr.bf16.vlgmr.msra.gmra.mxu1 %v1059_v43 }
 0x5c6   : > { %2476 = vmatpush3.bf16.msra.mxu1 %v2829_v11  ;;  %2481 = vmatprep.mubr.msk.bf16.mxu1 %vm2715_vm1, %v2714_v3 }
 0x5c7   : > { %2477 = vmatprep.subr.bf16.mxu1 %v2714_v3 }
 0x5ca   : > { %2478 = vmatpush3.bf16.msra.mxu1 %v2836_v12 }
 0x5cb   : > { %2479 = vmatprep.subr.bf16.mxu1 %v2714_v3 }
 0x5ce   : > { %2480 = vmatpush3.bf16.msra.mxu1 %v2855_v16 }
 0x5cf   : > { %2485 = vmatprep.subr.bf16.mxu1 %v2714_v3 }
 0x5f3   : > { %v1147_v50 = vpop.f32.mrf.mxu0 }
 0x5f5   : > { %v2465_v52 = vpop.f32.mrf.mxu0 }
 0x5f7   : > { %v1150_v56 = vpop.f32.mrf.mxu0 }
 0x665   : > { %v1001_v39 = vpop.f32.mrf.mxu1 }
 0x666   : > { %v1007_v59 = vadd.f32 %v1001_v39, %v955_v57  ;;  %v2466_v39 = vpop.f32.mrf.mxu0 }
 0x667   : > { %v2455_v61 = vpop.f32.mrf.mxu1 }
 0x668   : > { %2619 = vtanh.f32 %v1007_v59  ;;  %v2142_v19 = vmul.f32 -1.442695, %v1007_v59 }
 0x669   : > { %v1004_v62 = vpop.f32.mrf.mxu1 }
 0x66a   : > { %2621 = vpow2.f32 %v2142_v19  ;;  %v1226_v19 = vstv %s1225_s13 }
 0x66b   : > { %v2456_v63 = vpop.f32.mrf.mxu1  ;;  %vm1227_vm11 = vcmp.lt.s32.totalorder %v1226_v19, %v2963_v60 }
 0x675   : > { %v2620_v9 = vpop.eup %2619 }
 0x676   : > { %1017 = vrot.lane.b32.xlu0 %v2620_v9, %s2718_s7 }
 0x677   : > { %v2622_v21 = vpop.eup %2621 }
 0x678   : > { %v1011_v24 = vadd.f32 1.0, %v2622_v21 }
 0x67a   : > { %1037 = vperm.xlu0 %2581, %v1035_v18   ;;  %2623 = vrcp.f32 %v1011_v24  ;;  %v1228_v24 = vsel %vm1227_vm11, 1, %v2717_v54 }
 0x685   : > { %v2274_v51 = vpop.f32.mrf.mxu1 }
 0x687   : > { %v2624_v28 = vpop.eup %2623  ;;  %v2275_v53 = vpop.f32.mrf.mxu1 }
 0x688   : > { %v1015_v38 = vmul.f32 %v2624_v28, %v3086_v37  ;;  %v2276_v55 = vadd.f32 %v2275_v53, %v2274_v51 }
 0x689   : > { %v2277_v57 = vpop.f32.mrf.mxu1 }
 0x68a   : > { %v1108_v58 = vadd.f32 %v2276_v55, %v2953_v42 }
 0x68b   : > { %v2278_v59 = vpop.f32.mrf.mxu1 }
 0x68c   : > { %v1148_v61 = vadd.f32 %v1147_v50, %v1108_v58 }
 0x6e8   : > { %v1018_v30 = vpop.permute.xlu0 %1017 }
 0x6e9   : > { %v1020_v36 = vmul.f32 %v2624_v28, %v1018_v30 }
 0x6eb   : > { %1022 = vrot.lane.b32.xlu1 %v1020_v36, %s2718_s7 }
 0x6f5   : > { %v1038_v32 = vpop.permute.xlu0 %1037 }
 0x6f6   : > { %vm1039_vm10 = vcmp.eq.s32.totalorder %v1038_v32, 1 }
 0x75d   : > { %v1023_v40 = vpop.permute.xlu1 %1022 }
 0x75e   : > { %v3089_v41 = vadd.f32 %v1023_v40, %v1015_v38 }
 0x760   : > { %2625 = vtanh.f32 %v3089_v41  ;;  %v3144_v35 = vsel %vm1039_vm10, %v3089_v41, %v3086_v37 }
 0x76d   : > { %v2626_v25 = vpop.eup %2625 }
 0x76e   : > { %1028 = vrot.lane.b32.xlu1 %v2626_v25, %s2718_s7  ;;  %v2149_v25 = vld.sshfl [vmem:[%s2776_s27 + $0xc] sm:$0x13 pattern:$0x75316420] }
 0x7e0   : > { %v1029_v20 = vpop.permute.xlu1 %1028 }
 0x7e1   : > { %v1031_v47 = vmul.f32 %v2624_v28, %v1029_v20  ;;  %v1245_v20 = vcombine.high %v2149_v25, %v2149_v25 }
 0x7e3   : > { %v3113_v48 = vsel %vm1039_vm10, %v1031_v47, %v3055_v44  ;;  %v1252_v47 = vrot.slane %v2149_v25, %v2879_v26 }
 0x7e4   : > { %v1153_v49 = vpack.c.bf16 %v3113_v48, %v3113_v48 }
 0x7e5   : > { %v1260_v50 = vcombine.high %v1252_v47, %v1252_v47 }
 0x7e6   : > { %1155 = vrot.lane.b32.xlu1 %v1153_v49, %s2719_s10  ;;  %v1259_v49 = vrot.slane %v1245_v20, %v2879_v26 }
 0x7e7   : > { %2482 = vmatmul.mubr.msk.bf16.vlgmr.msra.gmra.mxu1 %vm469_vm3, %v1260_v50 }
 0x7e8   : > { %2486 = vmatpush3.bf16.msra.mxu1 %v2898_v31  ;;  %2489 = vmatprep.mubr.msk.bf16.mxu1 %vm2715_vm1, %v2714_v3 }
 0x7e9   : > { %2487 = vmatprep.subr.bf16.mxu1 %v2714_v3 }
 0x7ec   : > { %2488 = vmatpush3.bf16.msra.mxu1 %v2912_v34 }
 0x7ed   : > { %2316 = vmatprep.subr.bf16.mxu1 %v2781_v1 }
 0x858   : > { %v1156_v62 = vpop.permute.xlu1 %1155 }
 0x859   : > { %2472 = vmatmul.mubr.msk.bf16.vlgmr.msra.gmra.mxu0 %vm570_vm4, %v1156_v62 }
 0x85a   : > { %2288 = vmatpush3.bf16.msra.mxu0 %v2786_v2  ;;  %1298 = vmatprep.mubr.bf16.mxu0 %v1259_v49 }
 0x85b   : > { %2289 = vmatprep.subr.bf16.mxu0 %v2793_v4 }
 0x85e   : > { %2290 = vmatpush3.bf16.msra.mxu0 %v2799_v5 }
 0x85f   : > { %2291 = vmatprep.subr.bf16.mxu0 %v2807_v6 }
 0x862   : > { %2292 = vmatpush3.bf16.msra.mxu0 %v2812_v7 }
 0x863   : > { %2293 = vmatprep.subr.bf16.mxu0 %v2818_v8 }
 0x866   : > { %2294 = vmatpush3.bf16.msra.mxu0 %v2827_v10 }
 0x867   : > { %2295 = vmatprep.subr.bf16.mxu0 %v2842_v13 }
 0x86a   : > { %2296 = vmatpush3.bf16.msra.mxu0 %v2848_v14 }
 0x86b   : > { %2297 = vmatprep.subr.bf16.mxu0 %v2861_v17 }
 0x86e   : > { %2298 = vmatpush3.bf16.msra.mxu0 %v2869_v22 }
 0x86f   : > { %2299 = vmatprep.subr.bf16.mxu0 %v2876_v23 }
 0x872   : > { %2300 = vmatpush3.bf16.msra.mxu0 %v2885_v27 }
 0x873   : > { %2301 = vmatprep.subr.bf16.mxu0 %v2892_v29 }
 0x876   : > { %2302 = vmatpush3.bf16.msra.mxu0 %v2904_v33 }
 0x877   : > { %2493 = vmatprep.subr.bf16.mxu0 %v2714_v3 }
 0x879   : > { %1299 = vmatmul.mubr.bf16.vlgmr.msra.gmra.mxu0 %v1252_v47 }
 0x87a   : > { %2494 = vmatpush3.bf16.msra.mxu0 %v2829_v11  ;;  %2499 = vmatprep.mubr.msk.bf16.mxu0 %vm2715_vm1, %v2714_v3 }
 0x87b   : > { %2495 = vmatprep.subr.bf16.mxu0 %v2714_v3 }
 0x87e   : > { %2496 = vmatpush3.bf16.msra.mxu0 %v2836_v12 }
 0x87f   : > { %2497 = vmatprep.subr.bf16.mxu0 %v2714_v3 }
 0x882   : > { %2498 = vmatpush3.bf16.msra.mxu0 %v2855_v16 }
 0x883   : > { %2503 = vmatprep.subr.bf16.mxu0 %v2714_v3 }
 0x8a7   : > { %v1340_v1 = vpop.f32.mrf.mxu1 }
 0x8a9   : > { %v2483_v56 = vpop.f32.mrf.mxu1 }
 0x8aa   : > { %v3254_v56 = vld [vmem:[%s3451_s2 + $0x70] sm:$0xff]  }
 0x8ab   : > { %v1343_v39 = vpop.f32.mrf.mxu1 }
 0x8ac   : > { %v3272_v39 = vld [vmem:[%s3451_s2 + $0x28] sm:$0xff]  }
 0x8ad   : > { %v2484_v62 = vpop.f32.mrf.mxu1 }
 0x8ae   : > { %v3290_v62 = vld [vmem:[%s3451_s2 + $0x58] sm:$0xff]  }
 0x919   : > { %v1194_v44 = vpop.f32.mrf.mxu0 }
 0x91a   : > { %v1200_v63 = vadd.f32 %v1194_v44, %v1148_v61 }
 0x91b   : > { %v2473_v0 = vpop.f32.mrf.mxu0 }
 0x91c   : > { %2627 = vtanh.f32 %v1200_v63  ;;  %v2147_v28 = vmul.f32 -1.442695, %v1200_v63 }
 0x91d   : > { %v1197_v9 = vpop.f32.mrf.mxu0 }
 0x91e   : > { %2629 = vpow2.f32 %v2147_v28 }
 0x91f   : > { %v2474_v18 = vpop.f32.mrf.mxu0 }
 0x929   : > { %v2628_v21 = vpop.eup %2627 }
 0x92a   : > { %1210 = vrot.lane.b32.xlu0 %v2628_v21, %s2718_s7 }
 0x92b   : > { %v2630_v30 = vpop.eup %2629 }
 0x92c   : > { %v1204_v36 = vadd.f32 1.0, %v2630_v30 }
 0x92e   : > { %1230 = vperm.xlu0 %2581, %v1228_v24   ;;  %2631 = vrcp.f32 %v1204_v36  ;;  %v2154_v36 = vld.sshfl [vmem:[%s2776_s27 + $0xf] sm:$0x13 pattern:$0x75316420] }
 0x939   : > { %v2303_v55 = vpop.f32.mrf.mxu0 }
 0x93b   : > { %v2632_v38 = vpop.eup %2631  ;;  %v2304_v57 = vpop.f32.mrf.mxu0 }
 0x93c   : > { %v1208_v43 = vmul.f32 %v2632_v38, %v3144_v35  ;;  %v2305_v58 = vadd.f32 %v2304_v57, %v2303_v55  ;;  %v3260_v57 = vld [vmem:[%s3451_s2 + $0x30] sm:$0xff]  }
 0x93d   : > { %v2306_v59 = vpop.f32.mrf.mxu0 }
 0x93e   : > { %v1301_v61 = vadd.f32 %v2305_v58, %v2953_v42  ;;  %v3266_v58 = vld [vmem:[%s3451_s2 + $0x68] sm:$0xff]   ;;  %v3278_v59 = vld [vmem:[%s3451_s2 + $0x60] sm:$0xff]  }
 0x93f   : > { %v2307_v44 = vpop.f32.mrf.mxu0 }
 0x940   : > { %v1341_v63 = vadd.f32 %v1340_v1, %v1301_v61  ;;  %v3284_v61 = vld [vmem:[%s3451_s2 + $0x20] sm:$0xff]   ;;  %v3296_v44 = vld [vmem:[%s3451_s2 + $0x18] sm:$0xff]  }
 0x99c   : > { %v1211_v40 = vpop.permute.xlu0 %1210 }
 0x99d   : > { %v1213_v15 = vmul.f32 %v2632_v38, %v1211_v40  ;;  %v1445_v40 = vrot.slane %v2154_v36, %v2879_v26 }
 0x99f   : > { %1215 = vrot.lane.b32.xlu1 %v1213_v15, %s2718_s7 }
 0x9a9   : > { %v1231_v41 = vpop.permute.xlu0 %1230 }
 0x9aa   : > { %vm1232_vm12 = vcmp.eq.s32.totalorder %v1231_v41, 1 }
 0xa11   : > { %v1216_v45 = vpop.permute.xlu1 %1215 }
 0xa12   : > { %v3147_v46 = vadd.f32 %v1216_v45, %v1208_v43  ;;  %v1453_v43 = vcombine.high %v1445_v40, %v1445_v40 }
 0xa14   : > { %2633 = vtanh.f32 %v3147_v46  ;;  %v3202_v21 = vsel %vm1232_vm12, %v3147_v46, %v3144_v35  ;;  %2500 = vmatmul.mubr.msk.bf16.vlgmr.msra.gmra.mxu0 %vm469_vm3, %v1453_v43 }
 0xa15   : > { %2504 = vmatpush3.bf16.msra.mxu0 %v2898_v31  ;;  %2507 = vmatprep.mubr.msk.bf16.mxu0 %vm2715_vm1, %v2714_v3  ;;  %v3225_v31 = vld [vmem:[%s3451_s2 + $0x78] sm:$0xff]  }
 0xa16   : > { %2505 = vmatprep.subr.bf16.mxu0 %v2714_v3 }
 0xa19   : > { %2506 = vmatpush3.bf16.msra.mxu0 %v2912_v34 }
 0xa1a   : > { %2345 = vmatprep.subr.bf16.mxu0 %v3225_v31 }
 0xa21   : > { %v2634_v37 = vpop.eup %2633 }
 0xa22   : > { %1221 = vrot.lane.b32.xlu1 %v2634_v37, %s2718_s7 }
 0xa94   : > { %v1222_v32 = vpop.permute.xlu1 %1221 }
 0xa95   : > { %v1224_v51 = vmul.f32 %v2632_v38, %v1222_v32  ;;  %v1438_v38 = vcombine.high %v2154_v36, %v2154_v36 }
 0xa97   : > { %v3171_v52 = vsel %vm1232_vm12, %v1224_v51, %v3113_v48  ;;  %v1452_v15 = vrot.slane %v1438_v38, %v2879_v26  ;;  %v3347_v38 = vld [vmem:[%s3452_s3] sm:$0xff]  }
 0xa98   : > { %v1346_v53 = vpack.c.bf16 %v3171_v52, %v3171_v52 }
 0xa9a   : > { %1348 = vrot.lane.b32.xlu0 %v1346_v53, %s2719_s10 }
 0xad4   : > { %v1533_v20 = vpop.f32.mrf.mxu0 }
 0xad6   : > { %v2501_v47 = vpop.f32.mrf.mxu0 }
 0xad8   : > { %v1536_v37 = vpop.f32.mrf.mxu0 }
 0xada   : > { %v2502_v51 = vpop.f32.mrf.mxu0 }
 0xb0c   : > { %v1349_v0 = vpop.permute.xlu0 %1348 }
 0xb0d   : > { %2490 = vmatmul.mubr.msk.bf16.vlgmr.msra.gmra.mxu1 %vm570_vm4, %v1349_v0 }
 0xb0e   : > { %2317 = vmatpush3.bf16.msra.mxu1 %v2786_v2  ;;  %1491 = vmatprep.mubr.bf16.mxu1 %v1452_v15 }
 0xb0f   : > { %2318 = vmatprep.subr.bf16.mxu1 %v2793_v4 }
 0xb12   : > { %2319 = vmatpush3.bf16.msra.mxu1 %v2799_v5 }
 0xb13   : > { %2320 = vmatprep.subr.bf16.mxu1 %v2807_v6 }
 0xb16   : > { %2321 = vmatpush3.bf16.msra.mxu1 %v2812_v7 }
 0xb17   : > { %2322 = vmatprep.subr.bf16.mxu1 %v2818_v8  ;;  %v1419_v8 = vstv %s1418_s14 }
 0xb18   : > { %vm1420_vm13 = vcmp.lt.s32.totalorder %v1419_v8, %v2963_v60 }
 0xb1a   : > { %2323 = vmatpush3.bf16.msra.mxu1 %v2827_v10 }
 0xb1b   : > { %2324 = vmatprep.subr.bf16.mxu1 %v2842_v13  ;;  %v1421_v13 = vsel %vm1420_vm13, 1, %v2717_v54 }
 0xb1e   : > { %2325 = vmatpush3.bf16.msra.mxu1 %v2848_v14 }
 0xb1f   : > { %2326 = vmatprep.subr.bf16.mxu1 %v2861_v17 }
 0xb22   : > { %2327 = vmatpush3.bf16.msra.mxu1 %v2869_v22 }
 0xb23   : > { %2328 = vmatprep.subr.bf16.mxu1 %v2876_v23 }
 0xb26   : > { %2329 = vmatpush3.bf16.msra.mxu1 %v2885_v27 }
 0xb27   : > { %2330 = vmatprep.subr.bf16.mxu1 %v2892_v29 }
 0xb2a   : > { %2331 = vmatpush3.bf16.msra.mxu1 %v2904_v33 }
 0xb2b   : > { %2511 = vmatprep.subr.bf16.mxu1 %v2714_v3 }
 0xb2d   : > { %1492 = vmatmul.mubr.bf16.vlgmr.msra.gmra.mxu1 %v1445_v40  ;;  %v2680_v40 = vld [vmem:[%s3451_s2 + $0x88] sm:$0xff]  }
 0xb2e   : > { %2512 = vmatpush3.bf16.msra.mxu1 %v2829_v11  ;;  %2517 = vmatprep.mubr.msk.bf16.mxu1 %vm2715_vm1, %v2714_v3 }
 0xb2f   : > { %2513 = vmatprep.subr.bf16.mxu1 %v2714_v3 }
 0xb32   : > { %2514 = vmatpush3.bf16.msra.mxu1 %v2836_v12 }
 0xb33   : > { %2515 = vmatprep.subr.bf16.mxu1 %v2714_v3 }
 0xb36   : > { %2516 = vmatpush3.bf16.msra.mxu1 %v2855_v16 }
 0xb37   : > { %2521 = vmatprep.subr.bf16.mxu1 %v2714_v3 }
 0xbcd   : > { %v1387_v2 = vpop.f32.mrf.mxu1 }
 0xbce   : > { %v1393_v4 = vadd.f32 %v1387_v2, %v1341_v63  ;;  %v3302_v63 = vld [vmem:[%s3451_s2 + $0x50] sm:$0xff]  }
 0xbcf   : > { %v2491_v5 = vpop.f32.mrf.mxu1 }
 0xbd0   : > { %2635 = vtanh.f32 %v1393_v4  ;;  %v2152_v14 = vmul.f32 -1.442695, %v1393_v4 }
 0xbd1   : > { %v1390_v6 = vpop.f32.mrf.mxu1 }
 0xbd2   : > { %2637 = vpow2.f32 %v2152_v14 }
 0xbd3   : > { %v2492_v7 = vpop.f32.mrf.mxu1 }
 0xbd4   : > { %v1612_v7 = vstv %s1611_s23 }
 0xbd5   : > { %vm1613_vm15 = vcmp.lt.s32.totalorder %v1612_v7, %v2963_v60 }
 0xbdd   : > { %v2636_v10 = vpop.eup %2635 }
 0xbde   : > { %1403 = vrot.lane.b32.xlu1 %v2636_v10, %s2718_s7 }
 0xbdf   : > { %v2638_v17 = vpop.eup %2637 }
 0xbe0   : > { %v1397_v48 = vadd.f32 1.0, %v2638_v17 }
 0xbe2   : > { %1423 = vperm.xlu1 %2580, %v1421_v13   ;;  %2639 = vrcp.f32 %v1397_v48 }
 0xbed   : > { %v2332_v16 = vpop.f32.mrf.mxu1 }
 0xbef   : > { %v2640_v9 = vpop.eup %2639  ;;  %v2333_v49 = vpop.f32.mrf.mxu1 }
 0xbf0   : > { %v1401_v24 = vmul.f32 %v2640_v9, %v3202_v21  ;;  %v2334_v50 = vadd.f32 %v2333_v49, %v2332_v16 }
 0xbf1   : > { %v2335_v41 = vpop.f32.mrf.mxu1 }
 0xbf2   : > { %v1494_v32 = vadd.f32 %v2334_v50, %v2953_v42 }
 0xbf3   : > { %v2336_v53 = vpop.f32.mrf.mxu1 }
 0xbf4   : > { %v1534_v1 = vadd.f32 %v1533_v20, %v1494_v32  ;;  %v2684_v53 = vld [vmem:[%s3451_s2 + $0x8] sm:$0xff]  }
 0xc50   : > { %v1404_v18 = vpop.permute.xlu1 %1403 }
 0xc51   : > { %v1406_v19 = vmul.f32 %v2640_v9, %v1404_v18  ;;  %v2159_v18 = vld.sshfl [vmem:[%s2776_s27 + $0x12] sm:$0x13 pattern:$0x75316420] }
 0xc53   : > { %1408 = vrot.lane.b32.xlu0 %v1406_v19, %s2718_s7  ;;  %v1631_v19 = vcombine.high %v2159_v18, %v2159_v18 }
 0xc5d   : > { %v3232_v45 = vpop.permute.xlu1 %1423 }
 0xc5e   : > { %vm1425_vm14 = vcmp.eq.s32.totalorder %v3232_v45, 1 }
 0xcc5   : > { %v1409_v28 = vpop.permute.xlu0 %1408 }
 0xcc6   : > { %v3205_v30 = vadd.f32 %v1409_v28, %v1401_v24  ;;  %v1638_v24 = vrot.slane %v2159_v18, %v2879_v26  ;;  %v1645_v28 = vrot.slane %v1631_v19, %v2879_v26 }
 0xcc8   : > { %2641 = vtanh.f32 %v3205_v30  ;;  %v3320_v14 = vsel %vm1425_vm14, %v3205_v30, %v3202_v21  ;;  %v1646_v36 = vcombine.high %v1638_v24, %v1638_v24  ;;  %v3333_v21 = vld [vmem:[%s3452_s3 + $0x8] sm:$0xff]  }
 0xcca   : > { %2518 = vmatmul.mubr.msk.bf16.vlgmr.msra.gmra.mxu1 %vm469_vm3, %v1646_v36 }
 0xccb   : > { %2522 = vmatpush3.bf16.msra.mxu1 %v3333_v21  ;;  %2525 = vmatprep.mubr.msk.bf16.mxu1 %vm2715_vm1, %v2714_v3 }
 0xccc   : > { %2523 = vmatprep.subr.bf16.mxu1 %v2714_v3 }
 0xccf   : > { %2524 = vmatpush3.bf16.msra.mxu1 %v3347_v38 }
 0xcd0   : > { %2374 = vmatprep.subr.bf16.mxu1 %v3225_v31 }
 0xcd5   : > { %v2642_v35 = vpop.eup %2641 }
 0xcd6   : > { %1414 = vrot.lane.b32.xlu0 %v2642_v35, %s2718_s7 }
 0xd48   : > { %v1415_v46 = vpop.permute.xlu0 %1414 }
 0xd49   : > { %v1417_v25 = vmul.f32 %v2640_v9, %v1415_v46 }
 0xd4b   : > { %v3238_v34 = vsel %vm1425_vm14, %v1417_v25, %v3171_v52  ;;  %v3248_v52 = vld [vmem:[%s3451_s2 + $0x38] sm:$0xff]  }
 0xd4c   : > { %v1539_v12 = vpack.c.bf16 %v3238_v34, %v3238_v34 }
 0xd4e   : > { %1541 = vrot.lane.b32.xlu1 %v1539_v12, %s2719_s10 }
 0xd8a   : > { %v1726_v46 = vpop.f32.mrf.mxu1 }
 0xd8c   : > { %v2519_v12 = vpop.f32.mrf.mxu1 }
 0xd8d   : > { %v2688_v12 = vld [vmem:[%s3450_s1] sm:$0x3] }
 0xd8e   : > { %v1729_v47 = vpop.f32.mrf.mxu1 }
 0xd90   : > { %v2520_v37 = vpop.f32.mrf.mxu1 }
 0xdc0   : > { %v1542_v55 = vpop.permute.xlu1 %1541 }
 0xdc1   : > { %2508 = vmatmul.mubr.msk.bf16.vlgmr.msra.gmra.mxu0 %vm570_vm4, %v1542_v55  ;;  %v2686_v55 = vld [vmem:[%s3451_s2] sm:$0xff]  }
 0xdc2   : > { %2346 = vmatpush3.bf16.msra.mxu0 %v3248_v52  ;;  %1684 = vmatprep.mubr.bf16.mxu0 %v1645_v28 }
 0xdc3   : > { %2347 = vmatprep.subr.bf16.mxu0 %v3254_v56 }
 0xdc6   : > { %2348 = vmatpush3.bf16.msra.mxu0 %v3260_v57 }
 0xdc7   : > { %2349 = vmatprep.subr.bf16.mxu0 %v3266_v58 }
 0xdca   : > { %2350 = vmatpush3.bf16.msra.mxu0 %v3272_v39 }
 0xdcb   : > { %2351 = vmatprep.subr.bf16.mxu0 %v3278_v59 }
 0xdce   : > { %2352 = vmatpush3.bf16.msra.mxu0 %v3284_v61 }
 0xdcf   : > { %2353 = vmatprep.subr.bf16.mxu0 %v3290_v62 }
 0xdd2   : > { %2354 = vmatpush3.bf16.msra.mxu0 %v3296_v44 }
 0xdd3   : > { %2355 = vmatprep.subr.bf16.mxu0 %v3302_v63 }
 0xdd6   : > { %2356 = vmatpush3.bf16.msra.mxu0 %v2869_v22 }
 0xdd7   : > { %2357 = vmatprep.subr.bf16.mxu0 %v2876_v23  ;;  %v1614_v23 = vsel %vm1613_vm15, 1, %v2717_v54 }
 0xdda   : > { %2358 = vmatpush3.bf16.msra.mxu0 %v2885_v27 }
 0xddb   : > { %2359 = vmatprep.subr.bf16.mxu0 %v2892_v29 }
 0xdde   : > { %2360 = vmatpush3.bf16.msra.mxu0 %v2904_v33 }
 0xddf   : > { %2529 = vmatprep.subr.bf16.mxu0 %v2714_v3 }
 0xde1   : > { %1685 = vmatmul.mubr.bf16.vlgmr.msra.gmra.mxu0 %v1638_v24 }
 0xde2   : > { %2530 = vmatpush3.bf16.msra.mxu0 %v2829_v11  ;;  %2535 = vmatprep.mubr.msk.bf16.mxu0 %vm2715_vm1, %v2714_v3  ;;  %v2681_v11 = vld [vmem:[%s3451_s2 + $0x80] sm:$0xff]  }
 0xde3   : > { %2531 = vmatprep.subr.bf16.mxu0 %v2714_v3 }
 0xde6   : > { %2532 = vmatpush3.bf16.msra.mxu0 %v2680_v40 }
 0xde7   : > { %2533 = vmatprep.subr.bf16.mxu0 %v2714_v3 }
 0xdea   : > { %2534 = vmatpush3.bf16.msra.mxu0 %v2681_v11 }
 0xdeb   : > { %2539 = vmatprep.subr.bf16.mxu0 %v2714_v3 }
 0xe81   : > { %v1580_v0 = vpop.f32.mrf.mxu0 }
 0xe82   : > { %v1586_v2 = vadd.f32 %v1580_v0, %v1534_v1  ;;  %v2685_v1 = vld [vmem:[%s3451_s2 + $0x40] sm:$0xff]  }
 0xe83   : > { %v2509_v4 = vpop.f32.mrf.mxu0 }
 0xe84   : > { %2643 = vtanh.f32 %v1586_v2  ;;  %v2157_v27 = vmul.f32 -1.442695, %v1586_v2 }
 0xe85   : > { %v1583_v5 = vpop.f32.mrf.mxu0 }
 0xe86   : > { %2645 = vpow2.f32 %v2157_v27 }
 0xe87   : > { %v2510_v6 = vpop.f32.mrf.mxu0 }
 0xe91   : > { %v2644_v22 = vpop.eup %2643 }
 0xe92   : > { %1596 = vrot.lane.b32.xlu0 %v2644_v22, %s2718_s7 }
 0xe93   : > { %v2646_v29 = vpop.eup %2645 }
 0xe94   : > { %v1590_v33 = vadd.f32 1.0, %v2646_v29 }
 0xe96   : > { %1616 = vperm.xlu0 %2581, %v1614_v23   ;;  %2647 = vrcp.f32 %v1590_v33  ;;  %v2164_v23 = vld.sshfl [vmem:[%s2776_s27 + $0x15] sm:$0x13 pattern:$0x75316420] }
 0xe97   : > { %v1824_v27 = vcombine.high %v2164_v23, %v2164_v23  ;;  %v1831_v29 = vrot.slane %v2164_v23, %v2879_v26 }
 0xe99   : > { %v1838_v33 = vrot.slane %v1824_v27, %v2879_v26 }
 0xea1   : > { %v2361_v25 = vpop.f32.mrf.mxu0 }
 0xea3   : > { %v2648_v8 = vpop.eup %2647  ;;  %v2362_v20 = vpop.f32.mrf.mxu0 }
 0xea4   : > { %v1594_v17 = vmul.f32 %v2648_v8, %v3320_v14  ;;  %v2363_v16 = vadd.f32 %v2362_v20, %v2361_v25  ;;  %v1998_v25 = vstv %s1997_s26 }
 0xea5   : > { %v2364_v49 = vpop.f32.mrf.mxu0 }
 0xea6   : > { %v1687_v50 = vadd.f32 %v2363_v16, %v2953_v42  ;;  %v2682_v42 = vld [vmem:[%s3451_s2 + $0x10] sm:$0xff]  }
 0xea7   : > { %v2365_v41 = vpop.f32.mrf.mxu0 }
 0xea8   : > { %v1727_v32 = vadd.f32 %v1726_v46, %v1687_v50 }
 0xf04   : > { %v1597_v10 = vpop.permute.xlu0 %1596 }
 0xf05   : > { %v1599_v13 = vmul.f32 %v2648_v8, %v1597_v10 }
 0xf07   : > { %1601 = vrot.lane.b32.xlu1 %v1599_v13, %s2718_s7 }
 0xf11   : > { %v3359_v15 = vpop.permute.xlu0 %1616 }
 0xf12   : > { %vm1618_vm0 = vcmp.eq.s32.totalorder %v3359_v15, 1 }
 0xf79   : > { %v1602_v48 = vpop.permute.xlu1 %1601 }
 0xf7a   : > { %v3323_v9 = vadd.f32 %v1602_v48, %v1594_v17 }
 0xf7c   : > { %2649 = vtanh.f32 %v3323_v9 }
 0xf89   : > { %v2650_v30 = vpop.eup %2649 }
 0xf8a   : > { %1607 = vrot.lane.b32.xlu1 %v2650_v30, %s2718_s7 }
 0xffc   : > { %v1608_v43 = vpop.permute.xlu1 %1607 }
 0xffd   : > { %v1610_v35 = vmul.f32 %v2648_v8, %v1608_v43  ;;  %v1839_v8 = vcombine.high %v1831_v29, %v1831_v29 }
 0xfff   : > { %v3365_v31 = vsel %vm1618_vm0, %v1610_v35, %v3238_v34  ;;  %v2683_v34 = vld [vmem:[%s3451_s2 + $0x48] sm:$0xff]   ;;  %2536 = vmatmul.mubr.msk.bf16.vlgmr.msra.gmra.mxu0 %vm469_vm3, %v1839_v8 }
0x1000   : > { %v1732_v45 = vpack.c.bf16 %v3365_v31, %v3365_v31  ;;  %2540 = vmatpush3.bf16.msra.mxu0 %v3333_v21  ;;  %2543 = vmatprep.mubr.msk.bf16.mxu0 %vm2715_vm1, %v2714_v3  ;;  %v2687_v21 = vld [vmem:[%s3453_s4] ss:$0 sm:$0xff]  ;;  %vm1999_vm1 = vcmp.lt.s32.totalorder %v1998_v25, %v2688_v12 }
0x1001   : > { %2541 = vmatprep.subr.bf16.mxu0 %v2714_v3  ;;  %v2000_v16 = vsel %vm1999_vm1, 1, %v2717_v54 }
0x1002   : > { %1734 = vrot.lane.b32.xlu0 %v1732_v45, %s2719_s10 }
0x1004   : > { %2542 = vmatpush3.bf16.msra.mxu0 %v3347_v38 }
0x1074   : > { %v1735_v51 = vpop.permute.xlu0 %1734 }
0x1075   : > { %2526 = vmatmul.mubr.msk.bf16.vlgmr.msra.gmra.mxu1 %vm570_vm4, %v1735_v51 }
0x1076   : > { %2375 = vmatpush3.bf16.msra.mxu1 %v3248_v52  ;;  %1877 = vmatprep.mubr.bf16.mxu1 %v1838_v33 }
0x1077   : > { %2376 = vmatprep.subr.bf16.mxu1 %v3254_v56 }
0x107a   : > { %2377 = vmatpush3.bf16.msra.mxu1 %v3260_v57 }
0x107b   : > { %2378 = vmatprep.subr.bf16.mxu1 %v3266_v58 }
0x107e   : > { %2379 = vmatpush3.bf16.msra.mxu1 %v3272_v39 }
0x107f   : > { %2380 = vmatprep.subr.bf16.mxu1 %v3278_v59  ;;  %v1805_v59 = vstv %s1804_s24 }
0x1080   : > { %vm1806_vm2 = vcmp.lt.s32.totalorder %v1805_v59, %v2963_v60  ;;  %v3406_v60 = vsel %vm1618_vm0, %v3323_v9, %v3320_v14 }
0x1082   : > { %2381 = vmatpush3.bf16.msra.mxu1 %v3284_v61 }
0x1083   : > { %2382 = vmatprep.subr.bf16.mxu1 %v3290_v62  ;;  %v1807_v62 = vsel %vm1806_vm2, 1, %v2717_v54 }
0x1086   : > { %2383 = vmatpush3.bf16.msra.mxu1 %v3296_v44 }
0x1087   : > { %2384 = vmatprep.subr.bf16.mxu1 %v3302_v63 }
0x108a   : > { %2385 = vmatpush3.bf16.msra.mxu1 %v2682_v42 }
0x108b   : > { %2386 = vmatprep.subr.bf16.mxu1 %v2683_v34 }
0x108e   : > { %2387 = vmatpush3.bf16.msra.mxu1 %v2684_v53 }
0x108f   : > { %2388 = vmatprep.subr.bf16.mxu1 %v2685_v1 }
0x1092   : > { %2389 = vmatpush3.bf16.msra.mxu1 %v2686_v55 }
0x1095   : > { %1878 = vmatmul.mubr.bf16.vlgmr.msra.gmra.mxu1 %v1831_v29 }
0x10bf   : > { %v1919_v9 = vpop.f32.mrf.mxu0 }
0x10c1   : > { %v2537_v19 = vpop.f32.mrf.mxu0 }
0x10c3   : > { %v1922_v3 = vpop.f32.mrf.mxu0 }
0x10c5   : > { %v2538_v38 = vpop.f32.mrf.mxu0 }
0x1135   : > { %v1773_v52 = vpop.f32.mrf.mxu1 }
0x1136   : > { %v1779_v56 = vadd.f32 %v1773_v52, %v1727_v32 }
0x1137   : > { %v2527_v57 = vpop.f32.mrf.mxu1 }
0x1138   : > { %2651 = vtanh.f32 %v1779_v56  ;;  %v2162_v44 = vmul.f32 -1.442695, %v1779_v56 }
0x1139   : > { %v1776_v58 = vpop.f32.mrf.mxu1 }
0x113a   : > { %2653 = vpow2.f32 %v2162_v44 }
0x113b   : > { %v2528_v39 = vpop.f32.mrf.mxu1 }
0x1145   : > { %v2652_v61 = vpop.eup %2651 }
0x1146   : > { %1789 = vrot.lane.b32.xlu1 %v2652_v61, %s2718_s7 }
0x1147   : > { %v2654_v63 = vpop.eup %2653 }
0x1148   : > { %v1783_v0 = vadd.f32 1.0, %v2654_v63 }
0x114a   : > { %1809 = vperm.xlu1 %2580, %v1807_v62   ;;  %2655 = vrcp.f32 %v1783_v0 }
0x1155   : > { %v2390_v18 = vpop.f32.mrf.mxu1 }
0x1157   : > { %v2656_v2 = vpop.eup %2655  ;;  %v2391_v24 = vpop.f32.mrf.mxu1 }
0x1158   : > { %v1787_v6 = vmul.f32 %v2656_v2, %v3406_v60  ;;  %v2392_v28 = vadd.f32 %v2391_v24, %v2390_v18 }
0x1159   : > { %v2393_v36 = vpop.f32.mrf.mxu1 }
0x115a   : > { %v1880_v30 = vadd.f32 %v2687_v21, %v2392_v28 }
0x115b   : > { %v2394_v40 = vpop.f32.mrf.mxu1 }
0x115c   : > { %v1920_v11 = vadd.f32 %v1919_v9, %v1880_v30 }
0x11b8   : > { %v1790_v4 = vpop.permute.xlu1 %1789 }
0x11b9   : > { %v1792_v5 = vmul.f32 %v2656_v2, %v1790_v4 }
0x11bb   : > { %1794 = vrot.lane.b32.xlu0 %v1792_v5, %s2718_s7 }
0x11c5   : > { %v1810_v13 = vpop.permute.xlu1 %1809 }
0x11c6   : > { %vm1811_vm5 = vcmp.eq.s32.totalorder %v1810_v13, 1 }
0x122d   : > { %v1795_v7 = vpop.permute.xlu0 %1794 }
0x122e   : > { %v1797_v22 = vadd.f32 %v1795_v7, %v1787_v6 }
0x1230   : > { %2657 = vtanh.f32 %v1797_v22  ;;  %v1813_v51 = vsel %vm1811_vm5, %v1797_v22, %v3406_v60 }
0x123d   : > { %v2658_v10 = vpop.eup %2657 }
0x123e   : > { %1800 = vrot.lane.b32.xlu0 %v2658_v10, %s2718_s7 }
0x12b0   : > { %v1801_v14 = vpop.permute.xlu0 %1800 }
0x12b1   : > { %v1803_v26 = vmul.f32 %v2656_v2, %v1801_v14 }
0x12b3   : > { %v1812_v17 = vsel %vm1811_vm5, %v1803_v26, %v3365_v31 }
0x12b4   : > { %v1925_v48 = vpack.c.bf16 %v1812_v17, %v1812_v17 }
0x12b6   : > { %1927 = vrot.lane.b32.xlu1 %v1925_v48, %s2719_s10 }
0x1328   : > { %v1928_v15 = vpop.permute.xlu1 %1927 }
0x1329   : > { %2544 = vmatmul.mubr.msk.bf16.vlgmr.msra.gmra.mxu0 %vm570_vm4, %v1928_v15  ;;  %vm2011_vm4 = vcmask 254976  }
0x13e9   : > { %v1966_v43 = vpop.f32.mrf.mxu0 }
0x13ea   : > { %v1972_v35 = vadd.f32 %v1966_v43, %v1920_v11 }
0x13eb   : > { %v2545_v31 = vpop.f32.mrf.mxu0 }
0x13ec   : > { %2659 = vtanh.f32 %v1972_v35  ;;  %v2167_v47 = vmul.f32 -1.442695, %v1972_v35 }
0x13ed   : > { %v1969_v45 = vpop.f32.mrf.mxu0 }
0x13ee   : > { %2661 = vpow2.f32 %v2167_v47 }
0x13ef   : > { %v2546_v46 = vpop.f32.mrf.mxu0 }
0x13f9   : > { %v2660_v20 = vpop.eup %2659 }
0x13fa   : > { %1982 = vrot.lane.b32.xlu0 %v2660_v20, %s2718_s7 }
0x13fb   : > { %v2662_v49 = vpop.eup %2661 }
0x13fc   : > { %v1976_v50 = vadd.f32 1.0, %v2662_v49 }
0x13fe   : > { %2002 = vperm.xlu0 %2581, %v2000_v16   ;;  %2663 = vrcp.f32 %v1976_v50 }
0x140b   : > { %v2664_v37 = vpop.eup %2663 }
0x140c   : > { %v1980_v42 = vmul.f32 %v2664_v37, %v1813_v51 }
0x146c   : > { %v1983_v41 = vpop.permute.xlu0 %1982 }
0x146d   : > { %v1985_v32 = vmul.f32 %v2664_v37, %v1983_v41 }
0x146f   : > { %1987 = vrot.lane.b32.xlu1 %v1985_v32, %s2718_s7 }
0x1479   : > { %v2003_v54 = vpop.permute.xlu0 %2002 }
0x147a   : > { %vm2004_vm3 = vcmp.eq.s32.totalorder %v2003_v54, 1 }
0x14e1   : > { %v1988_v34 = vpop.permute.xlu1 %1987 }
0x14e2   : > { %v1990_v53 = vadd.f32 %v1988_v34, %v1980_v42 }
0x14e4   : > { %2665 = vtanh.f32 %v1990_v53  ;;  %v2006_v55 = vsel %vm2004_vm3, %v1990_v53, %v1813_v51 }
0x14f1   : > { %v2666_v1 = vpop.eup %2665 }
0x14f2   : > { %1993 = vrot.lane.b32.xlu1 %v2666_v1, %s2718_s7 }
0x14f6   : > { %2014 = vrot.lane.b32.xlu1 %v2006_v55, %s2720_s22 }
0x1564   : > { %v1994_v52 = vpop.permute.xlu1 %1993 }
0x1565   : > { %v1996_v56 = vmul.f32 %v2664_v37, %v1994_v52 }
0x1567   : > { %v2005_v57 = vsel %vm2004_vm3, %v1996_v56, %v1812_v17 }
0x1568   : > { %2008 = vrot.lane.b32.xlu0 %v2005_v57, %s2719_s10  ;;  %v2015_v58 = vpop.permute.xlu1 %2014 }
0x1569   : > { %2017 = vst.msk [vmem:[#allocation3] sm:$0x3] %vm2011_vm4, %v2015_v58 }
0x15da   : > { %v2009_v39 = vpop.permute.xlu0 %2008 }
0x15db   : > { %2012 = vst.msk [vmem:[#allocation2] sm:$0x3] %vm2011_vm4, %v2009_v39  ;;  %2018 = vst.msk [vmem:[%s3454_s5] sm:$0x3] %vm2011_vm4, %v2009_v39 }
0x15dc PF: > { %s15_s20 = sadd.s32 1, %s2711_s20   ;;  %s3455_s18 = smov %s2707_s19 }
0x15dd   : > { %p12_p6 = scmp.ge.s32.totalorder %s15_s20, 4   ;;  %s3456_s19 = smov %s3458_s21 }
0x15df   :  { %14 = sbr.rel (!%p12_p6) target bundleno = 2 (0x2), region = 84 }

</bundles_post_ra>
